<compile_context>
chip_gen: v6e
topology: v6e:2x2x1
jax: 0.10.0
libtpu: 0.0.40
codegen_flags: <defaults>
</compile_context>

<pallas_src>
import jax
import jax.numpy as jnp
from jax.experimental import pallas as pl
from jax.experimental.pallas import tpu as pltpu


def _magic_isdp_kernel(q_ref, k_ref, vt_ref, eye_ref, invpl_ref,
                       attn_ref, outt_ref):
    q = q_ref[...]            # (bb, P, d)  -- already pre-scaled by 1/scale
    k = k_ref[...]            # (bb, P, d)
    vt = vt_ref[...]          # (bb, d, P)  -- V transposed (lane-dense)

    # scores S = Q @ K^T (batched over the block of batch elements)
    s = jnp.einsum('bqc,bkc->bqk', q, k, preferred_element_type=jnp.float32)

    # numerically-stable row softmax; the 1/(P + lamb) normalizer is folded
    # into the reciprocal, which runs on the EUP slot (co-issues with VPU).
    m = jnp.max(s, axis=-1, keepdims=True)
    e = jnp.exp(s - m)
    inv = pl.reciprocal(jnp.sum(e, axis=-1, keepdims=True), approx=True)
    attn = e * (inv * invpl_ref[0]) + eye_ref[...]   # eye = lamb/(P+lamb) * I

    attn_ref[...] = attn

    # (attn @ V)^T stored lane-dense as (bb, d, P); wrapper transposes back.
    outt_ref[...] = jnp.einsum('bck,bqk->bcq', vt, attn,
                               preferred_element_type=jnp.float32)


def _pick_block_b(batch):
    """Batch elements per grid step: amortize per-step overhead while keeping
    >= 2 grid steps when possible (v7x has 2 TensorCores)."""
    if batch <= 2:
        return 1
    for bb in (8, 4, 2):
        if batch % bb == 0 and batch // bb >= 2:
            return bb
    return 1


def magic_isdp_forward(x, logdet, params, p_size):
    """Forward (reverse=False) pass of MagicISDP.  Returns (output, logdet)."""
    P = p_size * p_size
    N, C = x.shape
    B = N // P
    d = C // 2                               # split_dim == 2 -> qk / v halves

    x = x.astype(jnp.float32)
    inp = x.reshape(B, P, C)
    qk = inp[..., :d]                         # first half, passed through

    scale = params["scale"].reshape(()).astype(jnp.float32)
    lamb = params["lamb"].reshape(()).astype(jnp.float32)
    inv_scale = 1.0 / scale
    inv_pl = 1.0 / (jnp.float32(P) + lamb)

    # Fused projection GEMM (hoisted out of the kernel): one (B*P, C) @ (C, 3d)
    # matmul produces Q (pre-scaled by 1/scale), K and V.  The 1x1 NCHW convs
    # of the module are exactly per-position linear maps x @ W^T + b.
    wq_s = params["wq"].astype(jnp.float32) * inv_scale
    bq_s = params["bq"].astype(jnp.float32) * inv_scale
    z = jnp.zeros((d, d), jnp.float32)
    w_big = jnp.concatenate([
        jnp.concatenate([wq_s.T, params["wk"].T.astype(jnp.float32), z], axis=1),
        jnp.concatenate([z, z, params["wv"].T.astype(jnp.float32)], axis=1),
    ], axis=0)                                                    # (C, 3d)
    b_big = jnp.concatenate([bq_s,
                             params["bk"].astype(jnp.float32),
                             params["bv"].astype(jnp.float32)])   # (3d,)
    qkv = (x @ w_big + b_big).reshape(B, P, 3 * d)
    q = qkv[..., :d]
    k = qkv[..., d:2 * d]
    vt = jnp.swapaxes(qkv[..., 2 * d:], -1, -2)                   # (B, d, P)

    eye_scaled = (jnp.eye(P, dtype=jnp.float32) * (lamb * inv_pl))[None]  # (1,P,P)
    inv_pl_arr = inv_pl.reshape(1)

    bb = _pick_block_b(B)

    grid_spec = pltpu.PrefetchScalarGridSpec(
        num_scalar_prefetch=0,
        grid=(B // bb,),
        in_specs=[
            pl.BlockSpec((bb, P, d), lambda b: (b, 0, 0)),      # Q (pre-scaled)
            pl.BlockSpec((bb, P, d), lambda b: (b, 0, 0)),      # K
            pl.BlockSpec((bb, d, P), lambda b: (b, 0, 0)),      # V^T
            pl.BlockSpec((1, P, P), lambda b: (0, 0, 0)),       # lamb/(P+lamb)*I
            pl.BlockSpec(memory_space=pltpu.MemorySpace.SMEM),  # 1/(P+lamb)
        ],
        out_specs=[
            pl.BlockSpec((bb, P, P), lambda b: (b, 0, 0)),      # attn
            pl.BlockSpec((bb, d, P), lambda b: (b, 0, 0)),      # (attn @ V)^T
        ],
    )

    attn, out_t = pl.pallas_call(
        _magic_isdp_kernel,
        out_shape=(jax.ShapeDtypeStruct((B, P, P), jnp.float32),
                   jax.ShapeDtypeStruct((B, d, P), jnp.float32)),
        grid_spec=grid_spec,
        compiler_params=pltpu.CompilerParams(dimension_semantics=("parallel",)),
    )(q, k, vt, eye_scaled, inv_pl_arr)

    # TODO(synk): torch.slogdet (pivoted LU factorization) has no clean Pallas
    # equivalent; computed in plain JAX on the kernel's attention output.  The
    # module's `logabsdet ** (-0.5)` is kept verbatim (it yields NaN for
    # negative logabsdet, exactly as the PyTorch code does).
    _, logabsdet = jnp.linalg.slogdet(attn)
    logdet_sdp = logabsdet ** (-0.5)
    logdet = logdet + jnp.repeat(logdet_sdp, P)

    out_attn = jnp.swapaxes(out_t, -1, -2)                        # (B, P, d)
    output = jnp.concatenate([qk, out_attn], axis=-1).reshape(B * P, C)
    return output, logdet


if __name__ == "__main__":
    key = jax.random.PRNGKey(0)
    p_size = 14                    # cfg.action_type != 'toy-example'
    P = p_size * p_size            # 196 patches
    B = 2                          # batch of images
    num_channels = 8
    split_dim = 2
    d = num_channels // split_dim  # d_split = 4
    cfg_lamb = 0.5

    k1, k2, k3, k4, k5, k6, k7 = jax.random.split(key, 7)
    params = dict(
        wq=0.1 * jax.random.normal(k1, (d, d), jnp.float32),
        bq=0.1 * jax.random.normal(k2, (d,), jnp.float32),
        wk=0.1 * jax.random.normal(k3, (d, d), jnp.float32),
        bk=0.1 * jax.random.normal(k4, (d,), jnp.float32),
        wv=0.1 * jax.random.normal(k5, (d, d), jnp.float32),
        bv=0.1 * jax.random.normal(k6, (d,), jnp.float32),
        scale=jnp.full((1, 1, 1), 10.0, jnp.float32),         # nn.Parameter init
        lamb=jnp.full((1, 1, 1), cfg_lamb, jnp.float32),      # cfg.lamb
        offset=jnp.full((1, 1, 1), 1.01, jnp.float32),        # unused in fwd
        scaling_diag=jnp.ones((196,), jnp.float32),           # unused in fwd
    )

    x = jax.random.normal(k7, (B * P, num_channels), jnp.float32)
    logdet0 = jnp.zeros((B * P,), jnp.float32)

    output, logdet = magic_isdp_forward(x, logdet0, params, p_size)
    jax.block_until_ready((output, logdet))

    # sanity check the Pallas attention path against a plain-JAX reference
    inp = x.reshape(B, P, num_channels)
    qk_r, v_r = inp[..., :d], inp[..., d:]
    Q = qk_r @ params["wq"].T + params["bq"]
    K = qk_r @ params["wk"].T + params["bk"]
    V = v_r @ params["wv"].T + params["bv"]
    s = jax.nn.softmax((Q @ jnp.swapaxes(K, 1, 2)) / params["scale"], axis=-1)
    A = (s + jnp.eye(P) * params["lamb"]) / (P + params["lamb"])
    ref_out = jnp.concatenate([qk_r, A @ V], axis=-1).reshape(B * P, num_channels)
    assert output.shape == (B * P, num_channels)
    assert logdet.shape == (B * P,)
    assert jnp.allclose(output, ref_out, atol=1e-3, rtol=1e-3)

    print("KERNEL_OK")
</pallas_src>

<mosaic_0001>
module attributes {stable_mosaic.version = 11 : i64} {
  func.func @_magic_isdp_kernel(%arg0: i32, %arg1: memref<1x196x4xf32, #tpu.memory_space<vmem>>, %arg2: memref<1x196x4xf32, #tpu.memory_space<vmem>>, %arg3: memref<1x4x196xf32, #tpu.memory_space<vmem>>, %arg4: memref<1x196x196xf32, #tpu.memory_space<vmem>>, %arg5: memref<1xf32, #tpu.memory_space<smem>>, %arg6: memref<1x196x196xf32, #tpu.memory_space<vmem>>, %arg7: memref<1x4x196xf32, #tpu.memory_space<vmem>>) attributes {dimension_semantics = [#tpu.dimension_semantics<parallel>], iteration_bounds = array<i64: 2>, scalar_prefetch = 0 : i64, scratch_operands = 0 : i64, tpu.core_type = #tpu.core_type<tc>, window_params = [{transform_indices = @transform_0, window_bounds = array<i64: 1, 196, 4>}, {transform_indices = @transform_1, window_bounds = array<i64: 1, 196, 4>}, {transform_indices = @transform_2, window_bounds = array<i64: 1, 4, 196>}, {pipeline_mode = #tpu.pipeline_mode<synchronous>, transform_indices = @transform_3, window_bounds = array<i64: 1, 196, 196>}, {transform_indices = @transform_4, window_bounds = array<i64: 1>}, {transform_indices = @transform_5, window_bounds = array<i64: 1, 196, 196>}, {transform_indices = @transform_6, window_bounds = array<i64: 1, 4, 196>}]} {
    %c0 = arith.constant 0 : index
    %c0_0 = arith.constant 0 : index
    %c0_1 = arith.constant 0 : index
    %0 = vector.load %arg1[%c0, %c0_0, %c0_1] : memref<1x196x4xf32, #tpu.memory_space<vmem>>, vector<1x196x4xf32>
    %c0_2 = arith.constant 0 : index
    %c0_3 = arith.constant 0 : index
    %c0_4 = arith.constant 0 : index
    %1 = vector.load %arg2[%c0_2, %c0_3, %c0_4] : memref<1x196x4xf32, #tpu.memory_space<vmem>>, vector<1x196x4xf32>
    %c0_5 = arith.constant 0 : index
    %c0_6 = arith.constant 0 : index
    %c0_7 = arith.constant 0 : index
    %2 = vector.load %arg3[%c0_5, %c0_6, %c0_7] : memref<1x4x196xf32, #tpu.memory_space<vmem>>, vector<1x4x196xf32>
    "tpu.trace_start"() <{level = 10 : i32, message = "bqc,bkc->bqk"}> : () -> ()
    %cst = arith.constant dense<0.000000e+00> : vector<1x196x196xf32>
    %3 = tpu.matmul %0, %1, %cst {dimension_numbers = #tpu.dot_dimension_numbers<[2], [2], [1], [1], [0, 0, 0, 1, 1, 1], [0], [0]>} : vector<1x196x4xf32>, vector<1x196x4xf32>, vector<1x196x196xf32> -> vector<1x196x196xf32>
    "tpu.trace_stop"() : () -> ()
    %cst_8 = arith.constant dense<0xFF800000> : vector<1x196xf32>
    %4 = vector.multi_reduction <maximumf>, %3, %cst_8 [2] : vector<1x196x196xf32> to vector<1x196xf32>
    %5 = vector.shape_cast %4 : vector<1x196xf32> to vector<1x196x1xf32>
    %6 = vector.broadcast %5 : vector<1x196x1xf32> to vector<1x196x196xf32>
    %7 = arith.subf %3, %6 : vector<1x196x196xf32>
    %8 = math.exp %7 : vector<1x196x196xf32>
    %cst_9 = arith.constant dense<0.000000e+00> : vector<1x196xf32>
    %9 = vector.multi_reduction <add>, %8, %cst_9 [2] : vector<1x196x196xf32> to vector<1x196xf32>
    %10 = vector.shape_cast %9 : vector<1x196xf32> to vector<1x196x1xf32>
    %11 = tpu.reciprocal %10 {approx = true} : vector<1x196x1xf32> -> vector<1x196x1xf32>
    %c0_10 = arith.constant 0 : index
    %12 = memref.load %arg5[%c0_10] : memref<1xf32, #tpu.memory_space<smem>>
    %13 = vector.broadcast %12 : f32 to vector<1x196x1xf32>
    %14 = arith.mulf %11, %13 : vector<1x196x1xf32>
    %15 = vector.broadcast %14 : vector<1x196x1xf32> to vector<1x196x196xf32>
    %16 = arith.mulf %8, %15 : vector<1x196x196xf32>
    %c0_11 = arith.constant 0 : index
    %c0_12 = arith.constant 0 : index
    %c0_13 = arith.constant 0 : index
    %17 = vector.load %arg4[%c0_11, %c0_12, %c0_13] : memref<1x196x196xf32, #tpu.memory_space<vmem>>, vector<1x196x196xf32>
    %18 = arith.addf %16, %17 : vector<1x196x196xf32>
    %c0_14 = arith.constant 0 : index
    %c0_15 = arith.constant 0 : index
    %c0_16 = arith.constant 0 : index
    %19 = vector.load %arg6[%c0_14, %c0_15, %c0_16] : memref<1x196x196xf32, #tpu.memory_space<vmem>>, vector<1x196x196xf32>
    tpu.vector_store %arg6[%c0_14, %c0_15, %c0_16], %18 {strides = array<i32>} : memref<1x196x196xf32, #tpu.memory_space<vmem>>, vector<1x196x196xf32>,
    "tpu.trace_start"() <{level = 10 : i32, message = "bck,bqk->bcq"}> : () -> ()
    %cst_17 = arith.constant dense<0.000000e+00> : vector<1x4x196xf32>
    %20 = tpu.matmul %2, %18, %cst_17 {dimension_numbers = #tpu.dot_dimension_numbers<[2], [2], [1], [1], [0, 0, 0, 1, 1, 1], [0], [0]>} : vector<1x4x196xf32>, vector<1x196x196xf32>, vector<1x4x196xf32> -> vector<1x4x196xf32>
    "tpu.trace_stop"() : () -> ()
    %c0_18 = arith.constant 0 : index
    %c0_19 = arith.constant 0 : index
    %c0_20 = arith.constant 0 : index
    %21 = vector.load %arg7[%c0_18, %c0_19, %c0_20] : memref<1x4x196xf32, #tpu.memory_space<vmem>>, vector<1x4x196xf32>
    tpu.vector_store %arg7[%c0_18, %c0_19, %c0_20], %20 {strides = array<i32>} : memref<1x4x196xf32, #tpu.memory_space<vmem>>, vector<1x4x196xf32>,
    return
  }
  func.func @transform_0(%arg0: i32) -> (i32, i32, i32) {
    %c0_i32 = arith.constant 0 : i32
    %c0_i32_0 = arith.constant 0 : i32
    %c0_i32_1 = arith.constant 0 : i32
    return %arg0, %c0_i32, %c0_i32_0 : i32, i32, i32
  }
  func.func @transform_1(%arg0: i32) -> (i32, i32, i32) {
    %c0_i32 = arith.constant 0 : i32
    %c0_i32_0 = arith.constant 0 : i32
    %c0_i32_1 = arith.constant 0 : i32
    return %arg0, %c0_i32, %c0_i32_0 : i32, i32, i32
  }
  func.func @transform_2(%arg0: i32) -> (i32, i32, i32) {
    %c0_i32 = arith.constant 0 : i32
    %c0_i32_0 = arith.constant 0 : i32
    %c0_i32_1 = arith.constant 0 : i32
    return %arg0, %c0_i32, %c0_i32_0 : i32, i32, i32
  }
  func.func @transform_3(%arg0: i32) -> (i32, i32, i32) {
    %c0_i32 = arith.constant 0 : i32
    %c0_i32_0 = arith.constant 0 : i32
    %c0_i32_1 = arith.constant 0 : i32
    %c0_i32_2 = arith.constant 0 : i32
    return %c0_i32, %c0_i32_0, %c0_i32_1 : i32, i32, i32
  }
  func.func @transform_4(%arg0: i32) -> i32 {
    %c0_i32 = arith.constant 0 : i32
    %c0_i32_0 = arith.constant 0 : i32
    return %c0_i32 : i32
  }
  func.func @transform_5(%arg0: i32) -> (i32, i32, i32) {
    %c0_i32 = arith.constant 0 : i32
    %c0_i32_0 = arith.constant 0 : i32
    %c0_i32_1 = arith.constant 0 : i32
    return %arg0, %c0_i32, %c0_i32_0 : i32, i32, i32
  }
  func.func @transform_6(%arg0: i32) -> (i32, i32, i32) {
    %c0_i32 = arith.constant 0 : i32
    %c0_i32_0 = arith.constant 0 : i32
    %c0_i32_1 = arith.constant 0 : i32
    return %arg0, %c0_i32, %c0_i32_0 : i32, i32, i32
  }
}

</mosaic_0001>

<bundles_post_ra>
// kernel: tpu_custom_call.1
= control target key start
LH: loop header
LB: loop body
LE: loop exit
PB: predicated region body
PF: predicated region fallthrough
CT: control target
= control target key end

     0   :  { %s3117_s0 = inlined_call_operand.vmem [shape: f32[2,196,4], index: 0, kind: input, shape index: {}]   ;;  %s3118_s1 = inlined_call_operand.vmem [shape: f32[2,196,4], index: 1, kind: input, shape index: {}]   ;;  %s3119_s2 = inlined_call_operand.vmem [shape: f32[2,4,196], index: 2, kind: input, shape index: {}]   ;;  %s3120_s3 = inlined_call_operand.vmem [shape: f32[1,196,196], index: 3, kind: input, shape index: {}]   ;;  %s3121_s4 = inlined_call_operand.<no memory space> [shape: f32[1], index: 4, kind: input, shape index: {}]   ;;  %s3122_s5 = inlined_call_operand.vmem [shape: f32[2,196,196], index: 5, kind: output, shape index: {0}]   ;;  %s3123_s6 = inlined_call_operand.hbm [shape: f32[2,4,196], index: 6, kind: output, shape index: {1}]  }
   0x1   :  { %12 = sst [smem:[#allocation2]] %s3121_s4 }
   0x2   :  { %13 = vsyncpa [#allocation4], 0 }
   0x3   :  { %15 = vsyncpa [#allocation4 + $0x1], 0  ;;  %s2004_s23 = smov 0   ;;  %s2006_s24 = smov 0  }
   0x4   :  { %s2008_s25 = smov 0   ;;  %s2010_s26 = smov 0  }
   0x5 LB: > { %s2025_s4 = sadd.s32 4294967295, %s1962_s26   ;;  %s1616_s27 = sadd.s32 4294967294, %s1962_s26   ;;  %s1962_s26 = sphi %s2010_s26, %s3144_s26   ;;  %s1958_s25 = sphi %s2008_s25, %s3143_s25   ;;  %s1954_s24 = sphi %s2006_s24, %s3142_s24   ;;  %s1950_s23 = sphi %s2004_s23, %s3141_s23  }
   0x6   : > { %s2029_s28 = sadd.s32 1, %s1962_s26   ;;  %s174_s29 = sadd.s32 1, %s1958_s25 }
   0x7   : > { %s171_s30 = ssub.s32 %s1962_s26, %s2029_s28  ;;  %p184_p0 = scmp.ne.s32.totalorder %s1958_s25, %s1954_s24 }
   0x8   : > { %p172_p1 = scmp.eq.s32.totalorder %s171_s30, 0  ;;  %p185_p2 = scmp.eq.s32.totalorder %s2025_s4, 1 }
   0x9   : > { %p190_p3 = scmp.ne.s32.totalorder %s1954_s24, %s1950_s23  ;;  %p191_p4 = scmp.eq.s32.totalorder %s1616_s27, 1 }
   0xa   : > { %s2040_s7 = scalar_select %p172_p1, %s1958_s25, %s174_s29  }
   0xb   : > { %p2042_p5 = por %p185_p2, %p184_p0  ;;  %p2046_p6 = por %p191_p4, %p190_p3 }
   0xc   : > { %p1619_p7 = scmp.ge.s32.totalorder %s1962_s26, 1  ;;  %p239_p8 = scmp.lt.s32.totalorder %s1962_s26, 3 }
   0xe   : > { %p240_p9 = pnand %p1619_p7, %p239_p8 }
  0x10   : > { %243 = sbr.rel (%p240_p9) target bundleno = 1017 (0x3f9), region = 40 }
  0x15   : > { %p284_p10 = scmp.lt.s32.totalorder %s2025_s4, 1  ;;  %v1964_v0 = vmov 0.0   ;;  %vm355_vm0 = vcmask 31744   ;;  %vm721_vm1 = vcmask 556032   ;;  %vm818_vm2 = vcmask 1043456   ;;  %s1101_s22 = sld [smem:[#allocation2]] }
  0x16   : > { %506 = vmatprep.subr.mxu0 %v1964_v0  ;;  %570 = vmatprep.mubr.f32.mxu0 %v1964_v0  ;;  %vm820_vm3 = vcmask 551936   ;;  %vm1482_vm4 = vcmask 556036   ;;  %s1965_s15 = smov [#allocation3]  }
  0x17   : > { %s2056_s10 = scalar_select %p284_p10, %s2025_s4, 1  ;;  %vm1483_vm5 = vmor %vm1482_vm4, %vm818_vm2 }
  0x19   : > { %s1709_s11 = smul.u32 200, %s2056_s10  ;;  %s1707_s18 = sshll.u32 %s2056_s10, 3 }
  0x1a   : > { %s298_s21 = scalar_lea.vmem %s3119_s2, %s1707_s18  ;;  %s1710_s27 = smul.u32 400, %s2056_s10 }
  0x1b   : > { %s2064_s14 = scalar_lea.vmem %s3118_s1, %s1709_s11  ;;  %s2144_s17 = scalar_lea.vmem %s3117_s0, %s1709_s11 }
  0x1c   : > { %v344_v1 = vld [vmem:[%s2064_s14 + $0x78] sm:$0xff]  ;;  %v343_v2 = vld [vmem:[%s2064_s14 + $0x70] sm:$0xff]  ;;  %v342_v3 = vld [vmem:[%s2064_s14 + $0x68] sm:$0xff] }
  0x1d   : > { %1626 = vmatpush1.xpose.msk.msra.mxu0 %vm355_vm0, %v344_v1  ;;  %v341_v4 = vld [vmem:[%s2064_s14 + $0x60] sm:$0xff]  ;;  %v340_v5 = vld [vmem:[%s2064_s14 + $0x58] sm:$0xff]  ;;  %v339_v6 = vld [vmem:[%s2064_s14 + $0x50] sm:$0xff] }
  0x1e   : > { %508 = vmatprep.subr.mxu0 %v1964_v0  ;;  %v338_v7 = vld [vmem:[%s2064_s14 + $0x48] sm:$0xff]  ;;  %v337_v8 = vld [vmem:[%s2064_s14 + $0x40] sm:$0xff]  ;;  %v336_v9 = vld [vmem:[%s2064_s14 + $0x38] sm:$0xff] }
  0x1f   : > { %v335_v10 = vld [vmem:[%s2064_s14 + $0x30] sm:$0xff]  ;;  %v334_v11 = vld [vmem:[%s2064_s14 + $0x28] sm:$0xff]  ;;  %v333_v12 = vld [vmem:[%s2064_s14 + $0x20] sm:$0xff] }
  0x20   : > { %v332_v13 = vld [vmem:[%s2064_s14 + $0x18] sm:$0xff]  ;;  %v331_v14 = vld [vmem:[%s2064_s14 + $0x10] sm:$0xff]  ;;  %v330_v15 = vld [vmem:[%s2064_s14 + $0x8] sm:$0xff] }
  0x21   : > { %1627 = vmatpush1.xpose.msk.msra.mxu0 %vm355_vm0, %v343_v2  ;;  %v329_v16 = vld [vmem:[%s2064_s14] sm:$0xff]  ;;  %v352_v18 = vld [vmem:[%s2064_s14 + $0xb8] sm:$0xff]  ;;  %v351_v19 = vld [vmem:[%s2064_s14 + $0xb0] sm:$0xff] }
  0x22   : > { %510 = vmatprep.subr.mxu0 %v1964_v0  ;;  %v353_v17 = vld [vmem:[%s2064_s14 + $0xc0] sm:$0xf]  ;;  %v350_v20 = vld [vmem:[%s2064_s14 + $0xa8] sm:$0xff]  ;;  %v348_v22 = vld [vmem:[%s2064_s14 + $0x98] sm:$0xff] }
  0x23   : > { %v349_v21 = vld [vmem:[%s2064_s14 + $0xa0] sm:$0xff]  ;;  %v347_v23 = vld [vmem:[%s2064_s14 + $0x90] sm:$0xff]  ;;  %v346_v24 = vld [vmem:[%s2064_s14 + $0x88] sm:$0xff] }
  0x24   : > { %v345_v25 = vld [vmem:[%s2064_s14 + $0x80] sm:$0xff]  ;;  %v305_v27 = vld [vmem:[%s2144_s17 + $0x8] sm:$0xff]  ;;  %v306_v28 = vld [vmem:[%s2144_s17 + $0x10] sm:$0xff]  ;;  %s2647_s14 = scalar_lea.vmem %s3122_s5, %s1710_s27 }
  0x25   : > { %1628 = vmatpush1.xpose.msk.msra.mxu0 %vm355_vm0, %v342_v3  ;;  %v304_v26 = vld [vmem:[%s2144_s17] sm:$0xff]  ;;  %v307_v29 = vld [vmem:[%s2144_s17 + $0x18] sm:$0xff]  ;;  %v309_v31 = vld [vmem:[%s2144_s17 + $0x28] sm:$0xff] }
  0x26   : > { %512 = vmatprep.subr.mxu0 %v1964_v0  ;;  %v308_v30 = vld [vmem:[%s2144_s17 + $0x20] sm:$0xff]  ;;  %v310_v32 = vld [vmem:[%s2144_s17 + $0x30] sm:$0xff]  ;;  %v311_v33 = vld [vmem:[%s2144_s17 + $0x38] sm:$0xff] }
  0x27   : > { %v312_v34 = vld [vmem:[%s2144_s17 + $0x40] sm:$0xff]  ;;  %v313_v35 = vld [vmem:[%s2144_s17 + $0x48] sm:$0xff]  ;;  %v314_v36 = vld [vmem:[%s2144_s17 + $0x50] sm:$0xff] }
  0x28   : > { %v315_v37 = vld [vmem:[%s2144_s17 + $0x58] sm:$0xff]  ;;  %v316_v38 = vld [vmem:[%s2144_s17 + $0x60] sm:$0xff]  ;;  %v317_v39 = vld [vmem:[%s2144_s17 + $0x68] sm:$0xff] }
  0x29   : > { %1629 = vmatpush1.xpose.msk.msra.mxu0 %vm355_vm0, %v341_v4  ;;  %v318_v40 = vld [vmem:[%s2144_s17 + $0x70] sm:$0xff]  ;;  %v319_v41 = vld [vmem:[%s2144_s17 + $0x78] sm:$0xff]  ;;  %v320_v42 = vld [vmem:[%s2144_s17 + $0x80] sm:$0xff] }
  0x2a   : > { %514 = vmatprep.subr.mxu0 %v1964_v0  ;;  %v321_v43 = vld [vmem:[%s2144_s17 + $0x88] sm:$0xff]  ;;  %v322_v44 = vld [vmem:[%s2144_s17 + $0x90] sm:$0xff]  ;;  %v323_v45 = vld [vmem:[%s2144_s17 + $0x98] sm:$0xff] }
  0x2b   : > { %v324_v46 = vld [vmem:[%s2144_s17 + $0xa0] sm:$0xff]  ;;  %v325_v47 = vld [vmem:[%s2144_s17 + $0xa8] sm:$0xff]  ;;  %v326_v48 = vld [vmem:[%s2144_s17 + $0xb0] sm:$0xff] }
  0x2c   : > { %v327_v49 = vld [vmem:[%s2144_s17 + $0xb8] sm:$0xff]  ;;  %v328_v50 = vld [vmem:[%s2144_s17 + $0xc0] sm:$0xf] }
  0x2d   : > { %1630 = vmatpush1.xpose.msk.msra.mxu0 %vm355_vm0, %v340_v5 }
  0x2e   : > { %516 = vmatprep.subr.mxu0 %v1964_v0 }
  0x31   : > { %1631 = vmatpush1.xpose.msk.msra.mxu0 %vm355_vm0, %v339_v6 }
  0x32   : > { %518 = vmatprep.subr.mxu0 %v1964_v0 }
  0x35   : > { %1632 = vmatpush1.xpose.msk.msra.mxu0 %vm355_vm0, %v338_v7 }
  0x36   : > { %520 = vmatprep.subr.mxu0 %v1964_v0 }
  0x39   : > { %1633 = vmatpush1.xpose.msk.msra.mxu0 %vm355_vm0, %v337_v8 }
  0x3a   : > { %522 = vmatprep.subr.mxu0 %v1964_v0 }
  0x3d   : > { %1634 = vmatpush1.xpose.msk.msra.mxu0 %vm355_vm0, %v336_v9 }
  0x3e   : > { %524 = vmatprep.subr.mxu0 %v1964_v0 }
  0x41   : > { %1635 = vmatpush1.xpose.msk.msra.mxu0 %vm355_vm0, %v335_v10 }
  0x42   : > { %526 = vmatprep.subr.mxu0 %v1964_v0 }
  0x45   : > { %1636 = vmatpush1.xpose.msk.msra.mxu0 %vm355_vm0, %v334_v11 }
  0x46   : > { %528 = vmatprep.subr.mxu0 %v1964_v0 }
  0x49   : > { %1637 = vmatpush1.xpose.msk.msra.mxu0 %vm355_vm0, %v333_v12 }
  0x4a   : > { %530 = vmatprep.subr.mxu0 %v1964_v0 }
  0x4d   : > { %1638 = vmatpush1.xpose.msk.msra.mxu0 %vm355_vm0, %v332_v13 }
  0x4e   : > { %532 = vmatprep.subr.mxu0 %v1964_v0 }
  0x51   : > { %1639 = vmatpush1.xpose.msk.msra.mxu0 %vm355_vm0, %v331_v14 }
  0x52   : > { %534 = vmatprep.subr.mxu0 %v1964_v0 }
  0x55   : > { %1640 = vmatpush1.xpose.msk.msra.mxu0 %vm355_vm0, %v330_v15 }
  0x56   : > { %536 = vmatprep.subr.mxu0 %v1964_v0 }
  0x59   : > { %1641 = vmatpush1.xpose.msk.msra.mxu0 %vm355_vm0, %v329_v16 }
  0x5a   : > { %552 = vmatprep.subr.mxu0 %v1964_v0 }
  0x5d   : > { %1642 = vmatpush2.xpose.msk.msra.mxu0 %vm355_vm0, %v353_v17 }
  0x5e   : > { %554 = vmatprep.subr.mxu0 %v1964_v0 }
  0x61   : > { %1643 = vmatpush2.xpose.msk.msra.mxu0 %vm355_vm0, %v352_v18 }
  0x62   : > { %556 = vmatprep.subr.mxu0 %v1964_v0 }
  0x65   : > { %1644 = vmatpush2.xpose.msk.msra.mxu0 %vm355_vm0, %v351_v19 }
  0x66   : > { %558 = vmatprep.subr.mxu0 %v1964_v0 }
  0x69   : > { %1645 = vmatpush2.xpose.msk.msra.mxu0 %vm355_vm0, %v350_v20 }
  0x6a   : > { %560 = vmatprep.subr.mxu0 %v1964_v0 }
  0x6d   : > { %1646 = vmatpush2.xpose.msk.msra.mxu0 %vm355_vm0, %v349_v21 }
  0x6e   : > { %562 = vmatprep.subr.mxu0 %v1964_v0 }
  0x71   : > { %1647 = vmatpush2.xpose.msk.msra.mxu0 %vm355_vm0, %v348_v22 }
  0x72   : > { %564 = vmatprep.subr.mxu0 %v1964_v0 }
  0x75   : > { %1648 = vmatpush2.xpose.msk.msra.mxu0 %vm355_vm0, %v347_v23 }
  0x76   : > { %566 = vmatprep.subr.mxu0 %v1964_v0 }
  0x79   : > { %1649 = vmatpush2.xpose.msk.msra.mxu0 %vm355_vm0, %v346_v24 }
  0x7a   : > { %568 = vmatprep.subr.mxu0 %v1964_v0 }
  0x7d   : > { %1650 = vmatpush2.xpose.msk.msra.mxu0 %vm355_vm0, %v345_v25 }
  0x80   : > { %1651 = vmatmul.mubr.msk.f32.vlgmr.msra.gmra.mxu0 %vm355_vm0, %v304_v26 }
  0x81   : > { %576 = vmatprep.mubr.f32.mxu0 %v1964_v0 }
  0x84   : > { %1652 = vmatmul.mubr.msk.f32.gmra.mxu0 %vm355_vm0, %v305_v27 }
  0x85   : > { %582 = vmatprep.mubr.f32.mxu0 %v1964_v0 }
  0x88   : > { %1653 = vmatmul.mubr.msk.f32.gmra.mxu0 %vm355_vm0, %v306_v28 }
  0x89   : > { %588 = vmatprep.mubr.f32.mxu0 %v1964_v0 }
  0x8c   : > { %1654 = vmatmul.mubr.msk.f32.gmra.mxu0 %vm355_vm0, %v307_v29 }
  0x8d   : > { %594 = vmatprep.mubr.f32.mxu0 %v1964_v0 }
  0x90   : > { %1655 = vmatmul.mubr.msk.f32.gmra.mxu0 %vm355_vm0, %v308_v30 }
  0x91   : > { %600 = vmatprep.mubr.f32.mxu0 %v1964_v0 }
  0x94   : > { %1656 = vmatmul.mubr.msk.f32.gmra.mxu0 %vm355_vm0, %v309_v31 }
  0x95   : > { %606 = vmatprep.mubr.f32.mxu0 %v1964_v0 }
  0x98   : > { %1657 = vmatmul.mubr.msk.f32.gmra.mxu0 %vm355_vm0, %v310_v32 }
  0x99   : > { %612 = vmatprep.mubr.f32.mxu0 %v1964_v0 }
  0x9c   : > { %1658 = vmatmul.mubr.msk.f32.gmra.mxu0 %vm355_vm0, %v311_v33 }
  0x9d   : > { %618 = vmatprep.mubr.f32.mxu0 %v1964_v0 }
  0xa0   : > { %1659 = vmatmul.mubr.msk.f32.gmra.mxu0 %vm355_vm0, %v312_v34 }
  0xa1   : > { %624 = vmatprep.mubr.f32.mxu0 %v1964_v0 }
  0xa4   : > { %1660 = vmatmul.mubr.msk.f32.gmra.mxu0 %vm355_vm0, %v313_v35 }
  0xa5   : > { %630 = vmatprep.mubr.f32.mxu0 %v1964_v0 }
  0xa8   : > { %1661 = vmatmul.mubr.msk.f32.gmra.mxu0 %vm355_vm0, %v314_v36 }
  0xa9   : > { %636 = vmatprep.mubr.f32.mxu0 %v1964_v0 }
  0xac   : > { %1662 = vmatmul.mubr.msk.f32.gmra.mxu0 %vm355_vm0, %v315_v37 }
  0xad   : > { %642 = vmatprep.mubr.f32.mxu0 %v1964_v0 }
  0xb0   : > { %1663 = vmatmul.mubr.msk.f32.gmra.mxu0 %vm355_vm0, %v316_v38 }
  0xb1   : > { %648 = vmatprep.mubr.f32.mxu0 %v1964_v0 }
  0xb4   : > { %1664 = vmatmul.mubr.msk.f32.gmra.mxu0 %vm355_vm0, %v317_v39 }
  0xb5   : > { %654 = vmatprep.mubr.f32.mxu0 %v1964_v0 }
  0xb8   : > { %1665 = vmatmul.mubr.msk.f32.gmra.mxu0 %vm355_vm0, %v318_v40 }
  0xb9   : > { %660 = vmatprep.mubr.f32.mxu0 %v1964_v0 }
  0xbc   : > { %1666 = vmatmul.mubr.msk.f32.gmra.mxu0 %vm355_vm0, %v319_v41 }
  0xbd   : > { %666 = vmatprep.mubr.f32.mxu0 %v1964_v0 }
  0xc0   : > { %1667 = vmatmul.mubr.msk.f32.gmra.mxu0 %vm355_vm0, %v320_v42 }
  0xc1   : > { %672 = vmatprep.mubr.f32.mxu0 %v1964_v0 }
  0xc4   : > { %1668 = vmatmul.mubr.msk.f32.gmra.mxu0 %vm355_vm0, %v321_v43 }
  0xc5   : > { %678 = vmatprep.mubr.f32.mxu0 %v1964_v0 }
  0xc8   : > { %1669 = vmatmul.mubr.msk.f32.gmra.mxu0 %vm355_vm0, %v322_v44 }
  0xc9   : > { %684 = vmatprep.mubr.f32.mxu0 %v1964_v0 }
  0xcc   : > { %1670 = vmatmul.mubr.msk.f32.gmra.mxu0 %vm355_vm0, %v323_v45 }
  0xcd   : > { %690 = vmatprep.mubr.f32.mxu0 %v1964_v0 }
  0xd0   : > { %1671 = vmatmul.mubr.msk.f32.gmra.mxu0 %vm355_vm0, %v324_v46 }
  0xd1   : > { %696 = vmatprep.mubr.f32.mxu0 %v1964_v0 }
  0xd4   : > { %1672 = vmatmul.mubr.msk.f32.gmra.mxu0 %vm355_vm0, %v325_v47 }
  0xd5   : > { %702 = vmatprep.mubr.f32.mxu0 %v1964_v0 }
  0xd8   : > { %1673 = vmatmul.mubr.msk.f32.gmra.mxu0 %vm355_vm0, %v326_v48 }
  0xd9   : > { %708 = vmatprep.mubr.f32.mxu0 %v1964_v0 }
  0xdc   : > { %1674 = vmatmul.mubr.msk.f32.gmra.mxu0 %vm355_vm0, %v327_v49 }
  0xdd   : > { %714 = vmatprep.mubr.f32.mxu0 %v1964_v0 }
  0xe0   : > { %1675 = vmatmul.mubr.msk.f32.gmra.mxu0 %vm355_vm0, %v328_v50 }
 0x140   : > { %v2221_v51 = vpop.f32.mrf.mxu0 }
 0x142   : > { %v2223_v52 = vpop.f32.mrf.mxu0 }
 0x144   : > { %v2225_v53 = vpop.f32.mrf.mxu0 }
 0x146   : > { %v2227_v54 = vpop.f32.mrf.mxu0 }
 0x148   : > { %v2229_v55 = vpop.f32.mrf.mxu0 }
 0x14a   : > { %v2231_v56 = vpop.f32.mrf.mxu0 }
 0x14b   : > { %v730_v46 = vsel %vm721_vm1, %v2231_v56, -inf }
 0x14c   : > { %v2233_v57 = vpop.f32.mrf.mxu0  ;;  %v731_v50 = vmax.f32 %v2229_v55, %v730_v46 }
 0x14e   : > { %v2235_v58 = vpop.f32.mrf.mxu0 }
 0x150   : > { %v2237_v59 = vpop.f32.mrf.mxu0 }
 0x152   : > { %v2239_v60 = vpop.f32.mrf.mxu0 }
 0x153   : > { %v738_v40 = vsel %vm721_vm1, %v2239_v60, -inf }
 0x154   : > { %v2241_v61 = vpop.f32.mrf.mxu0  ;;  %v739_v44 = vmax.f32 %v2237_v59, %v738_v40 }
 0x156   : > { %v2243_v62 = vpop.f32.mrf.mxu0 }
 0x158   : > { %v2245_v63 = vpop.f32.mrf.mxu0 }
 0x15a   : > { %v2247_v0 = vpop.f32.mrf.mxu0 }
 0x15b   : > { %v746_v34 = vsel %vm721_vm1, %v2247_v0, -inf }
 0x15c   : > { %v2249_v1 = vpop.f32.mrf.mxu0  ;;  %v747_v38 = vmax.f32 %v2245_v63, %v746_v34 }
 0x15e   : > { %v2251_v2 = vpop.f32.mrf.mxu0 }
 0x15f   : > { %v750_v47 = vsel %vm721_vm1, %v2251_v2, -inf }
 0x160   : > { %v2253_v3 = vpop.f32.mrf.mxu0 }
 0x162   : > { %v2255_v4 = vpop.f32.mrf.mxu0 }
 0x163   : > { %v754_v28 = vsel %vm721_vm1, %v2255_v4, -inf }
 0x164   : > { %v2257_v5 = vpop.f32.mrf.mxu0  ;;  %v755_v32 = vmax.f32 %v2253_v3, %v754_v28 }
 0x166   : > { %v2259_v6 = vpop.f32.mrf.mxu0 }
 0x167   : > { %v758_v41 = vsel %vm721_vm1, %v2259_v6, -inf }
 0x168   : > { %v2261_v7 = vpop.f32.mrf.mxu0  ;;  %v759_v45 = vmax.f32 %v2257_v5, %v758_v41 }
 0x16a   : > { %v2263_v8 = vpop.f32.mrf.mxu0 }
 0x16b   : > { %v762_v22 = vsel %vm721_vm1, %v2263_v8, -inf }
 0x16c   : > { %v2265_v9 = vpop.f32.mrf.mxu0  ;;  %v763_v26 = vmax.f32 %v2261_v7, %v762_v22 }
 0x16e   : > { %v2267_v10 = vpop.f32.mrf.mxu0 }
 0x16f   : > { %v766_v35 = vsel %vm721_vm1, %v2267_v10, -inf }
 0x170   : > { %v2269_v11 = vpop.f32.mrf.mxu0  ;;  %v767_v39 = vmax.f32 %v2265_v9, %v766_v35 }
 0x172   : > { %v2271_v12 = vpop.f32.mrf.mxu0 }
 0x173   : > { %v770_v18 = vsel %vm721_vm1, %v2271_v12, -inf }
 0x174   : > { %v2273_v13 = vpop.f32.mrf.mxu0  ;;  %v771_v21 = vmax.f32 %v2269_v11, %v770_v18  ;;  %v742_v18 = vsel %vm721_vm1, %v2243_v62, -inf }
 0x176   : > { %v2275_v14 = vpop.f32.mrf.mxu0 }
 0x177   : > { %v774_v15 = vsel %vm721_vm1, %v2275_v14, -inf }
 0x178   : > { %v2279_v16 = vpop.f32.mrf.mxu0  ;;  %v775_v17 = vmax.f32 %v2273_v13, %v774_v15  ;;  %v751_v15 = vmax.f32 %v2249_v1, %v750_v47 }
 0x17a   : > { %776 = vmax.xlane.f32.xlu1 %v775_v17  ;;  %v2284_v19 = vpop.f32.mrf.mxu0  ;;  %v722_v17 = vsel %vm721_vm1, %v2223_v52, -inf }
 0x17b   : > { %v778_v29 = vsel %vm721_vm1, %v2284_v19, -inf }
 0x17c   : > { %v2286_v20 = vpop.f32.mrf.mxu0  ;;  %v779_v33 = vmax.f32 %v2279_v16, %v778_v29 }
 0x17e   : > { %772 = vmax.xlane.f32.xlu1 %v771_v21  ;;  %v2291_v23 = vpop.f32.mrf.mxu0 }
 0x17f   : > { %v782_v24 = vsel %vm721_vm1, %v2291_v23, -inf }
 0x180   : > { %v2295_v25 = vpop.f32.mrf.mxu0  ;;  %v783_v27 = vmax.f32 %v2286_v20, %v782_v24  ;;  %v723_v24 = vmax.f32 %v2221_v51, %v722_v17 }
 0x182   : > { %764 = vmax.xlane.f32.xlu1 %v763_v26  ;;  %784 = vmax.xlane.f32.xlu0 %v783_v27  ;;  %v2303_v30 = vpop.f32.mrf.mxu0  ;;  %v743_v26 = vmax.f32 %v2241_v61, %v742_v18  ;;  %v734_v27 = vsel %vm721_vm1, %v2235_v58, -inf }
 0x183   : > { %3131 = vst [vmem:[#allocation6_spill] sm:$0xff] %v2303_v30 }
 0x184   : > { %v2305_v31 = vpop.f32.mrf.mxu0 }
 0x186   : > { %756 = vmax.xlane.f32.xlu1 %v755_v32  ;;  %780 = vmax.xlane.f32.xlu0 %v779_v33  ;;  %v2313_v36 = vpop.f32.mrf.mxu0  ;;  %v735_v32 = vmax.f32 %v2233_v57, %v734_v27  ;;  %v726_v33 = vsel %vm721_vm1, %v2227_v54, -inf }
 0x188   : > { %v2315_v37 = vpop.f32.mrf.mxu0 }
 0x18a   : > { %748 = vmax.xlane.f32.xlu1 %v747_v38  ;;  %768 = vmax.xlane.f32.xlu0 %v767_v39  ;;  %v2323_v42 = vpop.f32.mrf.mxu0  ;;  %v727_v38 = vmax.f32 %v2225_v53, %v726_v33 }
 0x18c   : > { %v2325_v43 = vpop.f32.mrf.mxu0 }
 0x18e   : > { %740 = vmax.xlane.f32.xlu1 %v739_v44  ;;  %760 = vmax.xlane.f32.xlu0 %v759_v45  ;;  %v2333_v48 = vpop.f32.mrf.mxu0 }
 0x190   : > { %v2335_v49 = vpop.f32.mrf.mxu0 }
 0x192   : > { %732 = vmax.xlane.f32.xlu1 %v731_v50  ;;  %752 = vmax.xlane.f32.xlu0 %v751_v15  ;;  %v2343_v21 = vpop.f32.mrf.mxu0  ;;  %v798_v15 = vsel %vm721_vm1, %v2333_v48, -inf }
 0x194   : > { %v2345_v22 = vpop.f32.mrf.mxu0 }
 0x196   : > { %724 = vmax.xlane.f32.xlu1 %v723_v24  ;;  %744 = vmax.xlane.f32.xlu0 %v743_v26  ;;  %v2351_v28 = vpop.f32.mrf.mxu0  ;;  %v799_v26 = vmax.f32 %v2325_v43, %v798_v15 }
 0x197   : > { %v806_v40 = vsel %vm721_vm1, %v2351_v28, -inf }
 0x198   : > { %v2353_v29 = vpop.f32.mrf.mxu0  ;;  %v807_v50 = vmax.f32 %v2345_v22, %v806_v40 }
 0x19a   : > { %736 = vmax.xlane.f32.xlu0 %v735_v32  ;;  %v2358_v34 = vpop.f32.mrf.mxu0  ;;  %v802_v32 = vsel %vm721_vm1, %v2343_v21, -inf }
 0x19b   : > { %v810_v17 = vsel %vm721_vm1, %v2358_v34, -inf  ;;  %v803_v33 = vmax.f32 %v2335_v49, %v802_v32 }
 0x19c   : > { %v2360_v35 = vpop.f32.mrf.mxu0  ;;  %v811_v27 = vmax.f32 %v2353_v29, %v810_v17 }
 0x19e   : > { %728 = vmax.xlane.f32.xlu0 %v727_v38  ;;  %v2363_v39 = vpop.f32.mrf.mxu0  ;;  %v794_v38 = vsel %vm721_vm1, %v2323_v42, -inf }
 0x19f   : > { %v814_v41 = vsel %vm721_vm1, %v2363_v39, -inf  ;;  %v795_v40 = vmax.f32 %v2315_v37, %v794_v38 }
 0x1a0   : > { %v2369_v44 = vpop.f32.mrf.mxu0  ;;  %v815_v45 = vmax.f32 %v2360_v35, %v814_v41  ;;  %v790_v41 = vsel %vm721_vm1, %v2313_v36, -inf }
 0x1a1   : > { %v819_v46 = vsel %vm818_vm2, %v2369_v44, -inf }
 0x1a2   : > { %816 = vmax.xlane.f32.xlu1 %v815_v45  ;;  %v2374_v47 = vpop.f32.mrf.mxu0  ;;  %v791_v45 = vmax.f32 %v2305_v31, %v790_v41 }
 0x1a3   : > { %v821_v18 = vsel %vm820_vm3, %v2374_v47, -inf }
 0x1a4   : > { %v822_v24 = vmax.f32 %v819_v46, %v821_v18  ;;  %v786_v46 = vsel %vm721_vm1, %v2303_v30, -inf }
 0x1a6   : > { %808 = vmax.xlane.f32.xlu1 %v807_v50  ;;  %823 = vmax.xlane.f32.xlu0 %v822_v24  ;;  %v787_v50 = vmax.f32 %v2295_v25, %v786_v46 }
 0x1aa   : > { %800 = vmax.xlane.f32.xlu1 %v799_v26  ;;  %812 = vmax.xlane.f32.xlu0 %v811_v27 }
 0x1ae   : > { %804 = vmax.xlane.f32.xlu0 %v803_v33 }
 0x1b2   : > { %796 = vmax.xlane.f32.xlu0 %v795_v40 }
 0x1b6   : > { %792 = vmax.xlane.f32.xlu0 %v791_v45 }
 0x1ba   : > { %788 = vmax.xlane.f32.xlu0 %v787_v50 }
 0x203   : > { %v777_v15 = vpop.xlane.xlu1 %776 }
 0x204   : > { %v851_v17 = vsub.f32 %v2273_v13, %v777_v15  ;;  %v852_v18 = vsub.f32 %v2275_v14, %v777_v15 }
 0x206   : > { %v927_v32 = vmul.f32 1.442695, %v851_v17  ;;  %v929_v40 = vmul.f32 1.442695, %v852_v18 }
 0x207   : > { %v773_v24 = vpop.xlane.xlu1 %772 }
 0x208   : > { %v849_v26 = vsub.f32 %v2269_v11, %v773_v24  ;;  %v850_v27 = vsub.f32 %v2271_v12, %v773_v24 }
 0x20a   : > { %v923_v33 = vmul.f32 1.442695, %v849_v26  ;;  %v925_v38 = vmul.f32 1.442695, %v850_v27 }
 0x20b   : > { %v765_v41 = vpop.xlane.xlu1 %764  ;;  %v785_v30 = vpop.xlane.xlu0 %784 }
 0x20c   : > { %1752 = vpow2.f32 %v923_v33  ;;  %v845_v45 = vsub.f32 %v2261_v7, %v765_v41  ;;  %v846_v46 = vsub.f32 %v2263_v8, %v765_v41  ;;  %v855_v13 = vsub.f32 %v2286_v20, %v785_v30 }
 0x20d   : > { %1754 = vpow2.f32 %v925_v38  ;;  %v856_v14 = vsub.f32 %v2291_v23, %v785_v30 }
 0x20e   : > { %1756 = vpow2.f32 %v927_v32  ;;  %v915_v11 = vmul.f32 1.442695, %v845_v45  ;;  %v917_v50 = vmul.f32 1.442695, %v846_v46  ;;  %v935_v12 = vmul.f32 1.442695, %v855_v13 }
 0x20f   : > { %1758 = vpow2.f32 %v929_v40  ;;  %v937_v15 = vmul.f32 1.442695, %v856_v14  ;;  %v757_v17 = vpop.xlane.xlu1 %756  ;;  %v781_v18 = vpop.xlane.xlu0 %780 }
 0x210   : > { %1760 = vpow2.f32 %v915_v11  ;;  %v841_v24 = vsub.f32 %v2253_v3, %v757_v17  ;;  %v842_v7 = vsub.f32 %v2255_v4, %v757_v17  ;;  %v853_v8 = vsub.f32 %v2279_v16, %v781_v18 }
 0x211   : > { %1762 = vpow2.f32 %v917_v50  ;;  %v854_v20 = vsub.f32 %v2284_v19, %v781_v18 }
 0x212   : > { %1764 = vpow2.f32 %v935_v12  ;;  %v907_v23 = vmul.f32 1.442695, %v841_v24  ;;  %v909_v30 = vmul.f32 1.442695, %v842_v7  ;;  %v931_v26 = vmul.f32 1.442695, %v853_v8 }
 0x213   : > { %1766 = vpow2.f32 %v937_v15  ;;  %v933_v27 = vmul.f32 1.442695, %v854_v20  ;;  %v749_v32 = vpop.xlane.xlu1 %748  ;;  %v769_v33 = vpop.xlane.xlu0 %768 }
 0x214   : > { %1768 = vpow2.f32 %v907_v23  ;;  %v837_v38 = vsub.f32 %v2245_v63, %v749_v32  ;;  %v838_v3 = vsub.f32 %v2247_v0, %v749_v32  ;;  %v848_v4 = vsub.f32 %v2267_v10, %v769_v33 }
 0x215   : > { %1770 = vpow2.f32 %v909_v30  ;;  %v847_v19 = vsub.f32 %v2265_v9, %v769_v33 }
 0x216   : > { %1772 = vpow2.f32 %v931_v26  ;;  %v899_v16 = vmul.f32 1.442695, %v837_v38  ;;  %v901_v40 = vmul.f32 1.442695, %v838_v3  ;;  %v921_v41 = vmul.f32 1.442695, %v848_v4 }
 0x217   : > { %1774 = vpow2.f32 %v933_v27  ;;  %v741_v45 = vpop.xlane.xlu1 %740  ;;  %v761_v46 = vpop.xlane.xlu0 %760  ;;  %v919_v11 = vmul.f32 1.442695, %v847_v19 }
 0x218   : > { %1776 = vpow2.f32 %v899_v16  ;;  %v833_v13 = vsub.f32 %v2237_v59, %v741_v45  ;;  %v834_v14 = vsub.f32 %v2239_v60, %v741_v45  ;;  %v844_v0 = vsub.f32 %v2259_v6, %v761_v46 }
 0x219   : > { %v2415_v63 = vpop.eup %1752  ;;  %1778 = vpow2.f32 %v901_v40  ;;  %v843_v9 = vsub.f32 %v2257_v5, %v761_v46 }
 0x21a   : > { %v2418_v10 = vpop.eup %1754  ;;  %v891_v50 = vmul.f32 1.442695, %v833_v13  ;;  %v893_v12 = vmul.f32 1.442695, %v834_v14  ;;  %1780 = vpow2.f32 %v921_v41  ;;  %v913_v17 = vmul.f32 1.442695, %v844_v0 }
 0x21b   : > { %v2421_v15 = vpop.eup %1756  ;;  %v733_v18 = vpop.xlane.xlu1 %732  ;;  %v1023_v60 = vsel %vm721_vm1, %v2418_v10, 0.0  ;;  %v911_v30 = vmul.f32 1.442695, %v843_v9 }
 0x21c   : > { %v753_v59 = vpop.xlane.xlu0 %752  ;;  %v2425_v24 = vpop.eup %1758  ;;  %1782 = vpow2.f32 %v891_v50  ;;  %v829_v6 = vsub.f32 %v2229_v55, %v733_v18  ;;  %v830_v7 = vsub.f32 %v2231_v56, %v733_v18  ;;  %v1024_v20 = vadd.f32 %v2415_v63, %v1023_v60 }
 0x21d   : > { %v2429_v8 = vpop.eup %1760  ;;  %1784 = vpow2.f32 %v893_v12  ;;  %v840_v5 = vsub.f32 %v2251_v2, %v753_v59  ;;  %v839_v55 = vsub.f32 %v2249_v1, %v753_v59 }
 0x21e   : > { %v2433_v23 = vpop.eup %1762  ;;  %1786 = vpow2.f32 %v919_v11  ;;  %v883_v26 = vmul.f32 1.442695, %v829_v6  ;;  %v885_v27 = vmul.f32 1.442695, %v830_v7  ;;  %1025 = vadd.xlane.f32.xlu0 %v1024_v20 }
 0x21f   : > { %v2435_v32 = vpop.eup %1764  ;;  %1788 = vpow2.f32 %v913_v17  ;;  %v905_v33 = vmul.f32 1.442695, %v840_v5  ;;  %v725_v56 = vpop.xlane.xlu1 %724  ;;  %v1015_v2 = vsel %vm721_vm1, %v2433_v23, 0.0 }
 0x220   : > { %v745_v38 = vpop.xlane.xlu0 %744  ;;  %v2440_v3 = vpop.eup %1766  ;;  %1790 = vpow2.f32 %v883_v26  ;;  %v825_v4 = vsub.f32 %v2221_v51, %v725_v56  ;;  %v826_v16 = vsub.f32 %v2223_v52, %v725_v56  ;;  %v1016_v41 = vadd.f32 %v2429_v8, %v1015_v2 }
 0x221   : > { %v2444_v40 = vpop.eup %1768  ;;  %1792 = vpow2.f32 %v885_v27  ;;  %v836_v19 = vsub.f32 %v2243_v62, %v745_v38  ;;  %v1035_v1 = vsel %vm721_vm1, %v2440_v3, 0.0  ;;  %v835_v14 = vsub.f32 %v2241_v61, %v745_v38 }
 0x222   : > { %v2450_v45 = vpop.eup %1770  ;;  %1794 = vpow2.f32 %v911_v30  ;;  %v875_v46 = vmul.f32 1.442695, %v825_v4  ;;  %v877_v13 = vmul.f32 1.442695, %v826_v16  ;;  %v903_v52 = vmul.f32 1.442695, %v839_v55  ;;  %1017 = vadd.xlane.f32.xlu0 %v1016_v41 }
 0x223   : > { %v2453_v51 = vpop.eup %1772  ;;  %1796 = vpow2.f32 %v905_v33  ;;  %v1036_v0 = vadd.f32 %v2435_v32, %v1035_v1  ;;  %v1007_v11 = vsel %vm721_vm1, %v2450_v45, 0.0  ;;  %v897_v12 = vmul.f32 1.442695, %v836_v19 }
 0x224   : > { %v737_v62 = vpop.xlane.xlu0 %736  ;;  %v2458_v50 = vpop.eup %1774  ;;  %1798 = vpow2.f32 %v875_v46  ;;  %v1008_v17 = vadd.f32 %v2444_v40, %v1007_v11  ;;  %v895_v60 = vmul.f32 1.442695, %v835_v14  ;;  %v1027_v27 = vsel %vm721_vm1, %v2425_v24, 0.0 }
 0x225   : > { %v832_v9 = vsub.f32 %v2235_v58, %v737_v62  ;;  %v2462_v61 = vpop.eup %1776  ;;  %1800 = vpow2.f32 %v877_v13  ;;  %1037 = vadd.xlane.f32.xlu1 %v1036_v0  ;;  %v1031_v18 = vsel %vm721_vm1, %v2458_v50, 0.0  ;;  %v831_v6 = vsub.f32 %v2233_v57, %v737_v62 }
 0x226   : > { %v2466_v59 = vpop.eup %1778  ;;  %v1032_v7 = vadd.f32 %v2453_v51, %v1031_v18  ;;  %1802 = vpow2.f32 %v903_v52  ;;  %1009 = vadd.xlane.f32.xlu0 %v1008_v17 }
 0x227   : > { %v889_v5 = vmul.f32 1.442695, %v832_v9  ;;  %v999_v20 = vsel %vm721_vm1, %v2466_v59, 0.0  ;;  %v2472_v30 = vpop.eup %1780  ;;  %1804 = vpow2.f32 %v897_v12  ;;  %v887_v56 = vmul.f32 1.442695, %v831_v6 }
 0x228   : > { %v729_v58 = vpop.xlane.xlu0 %728  ;;  %v1000_v55 = vadd.f32 %v2462_v61, %v999_v20  ;;  %1806 = vpow2.f32 %v895_v60 }
 0x229   : > { %v828_v26 = vsub.f32 %v2227_v54, %v729_v58  ;;  %v2478_v57 = vpop.eup %1782  ;;  %1033 = vadd.xlane.f32.xlu1 %v1032_v7  ;;  %v827_v38 = vsub.f32 %v2225_v53, %v729_v58  ;;  %1808 = vpow2.f32 %v889_v5  ;;  %v1028_v54 = vadd.f32 %v2421_v15, %v1027_v27 }
 0x22a   : > { %v2480_v33 = vpop.eup %1784  ;;  %1001 = vadd.xlane.f32.xlu0 %v1000_v55  ;;  %v1019_v53 = vsel %vm721_vm1, %v2472_v30, 0.0  ;;  %1810 = vpow2.f32 %v887_v56 }
 0x22b   : > { %v2483_v2 = vpop.eup %1786  ;;  %v881_v4 = vmul.f32 1.442695, %v828_v26  ;;  %v817_v16 = vpop.xlane.xlu1 %816  ;;  %v991_v19 = vsel %vm721_vm1, %v2480_v33, 0.0  ;;  %v879_v0 = vmul.f32 1.442695, %v827_v38 }
 0x22c   : > { %v2488_v1 = vpop.eup %1788  ;;  %v871_v41 = vsub.f32 %v2360_v35, %v817_v16  ;;  %v872_v46 = vsub.f32 %v2363_v39, %v817_v16  ;;  %v992_v13 = vadd.f32 %v2478_v57, %v991_v19  ;;  %v1020_v35 = vadd.f32 %v2483_v2, %v1019_v53 }
 0x22d   : > { %v2495_v14 = vpop.eup %1790  ;;  %1029 = vadd.xlane.f32.xlu1 %v1028_v54  ;;  %1812 = vpow2.f32 %v881_v4  ;;  %v1011_v17 = vsel %vm721_vm1, %v2488_v1, 0.0 }
 0x22e   : > { %v2497_v52 = vpop.eup %1792  ;;  %v967_v62 = vmul.f32 1.442695, %v871_v41  ;;  %v969_v11 = vmul.f32 1.442695, %v872_v46  ;;  %993 = vadd.xlane.f32.xlu0 %v992_v13 }
 0x22f   : > { %v2499_v12 = vpop.eup %1794  ;;  %v809_v39 = vpop.xlane.xlu1 %808  ;;  %v983_v18 = vsel %vm721_vm1, %v2497_v52, 0.0 }
 0x230   : > { %v824_v9 = vpop.xlane.xlu0 %823  ;;  %v2506_v60 = vpop.eup %1796  ;;  %1814 = vpow2.f32 %v967_v62  ;;  %v867_v6 = vsub.f32 %v2345_v22, %v809_v39  ;;  %v868_v7 = vsub.f32 %v2351_v28, %v809_v39  ;;  %v984_v26 = vadd.f32 %v2495_v14, %v983_v18 }
 0x231   : > { %v873_v5 = vsub.f32 %v2369_v44, %v824_v9  ;;  %v2511_v58 = vpop.eup %1798  ;;  %1816 = vpow2.f32 %v969_v11  ;;  %1021 = vadd.xlane.f32.xlu1 %v1020_v35  ;;  %v874_v20 = vsub.f32 %v2374_v47, %v824_v9  ;;  %v1012_v22 = vadd.f32 %v2499_v12, %v1011_v17 }
 0x232   : > { %v2515_v27 = vpop.eup %1800  ;;  %1818 = vpow2.f32 %v879_v0  ;;  %v959_v55 = vmul.f32 1.442695, %v867_v6  ;;  %v961_v56 = vmul.f32 1.442695, %v868_v7  ;;  %985 = vadd.xlane.f32.xlu0 %v984_v26  ;;  %v1003_v54 = vsel %vm721_vm1, %v2506_v60, 0.0 }
 0x233   : > { %v971_v38 = vmul.f32 1.442695, %v873_v5  ;;  %v973_v4 = vmul.f32 1.442695, %v874_v20  ;;  %v801_v28 = vpop.xlane.xlu1 %800  ;;  %v975_v47 = vsel %vm721_vm1, %v2515_v27, 0.0  ;;  %v2522_v16 = vpop.eup %1802 }
 0x234   : > { %v813_v44 = vpop.xlane.xlu0 %812  ;;  %1820 = vpow2.f32 %v959_v55  ;;  %v863_v19 = vsub.f32 %v2325_v43, %v801_v28  ;;  %v864_v41 = vsub.f32 %v2333_v48, %v801_v28  ;;  %v2527_v53 = vpop.eup %1804  ;;  %v976_v0 = vadd.f32 %v2511_v58, %v975_v47 }
 0x235   : > { %v869_v46 = vsub.f32 %v2353_v29, %v813_v44  ;;  %1822 = vpow2.f32 %v961_v56  ;;  %1013 = vadd.xlane.f32.xlu1 %v1012_v22  ;;  %v870_v13 = vsub.f32 %v2358_v34, %v813_v44  ;;  %v2531_v39 = vpop.eup %1806  ;;  %v1004_v48 = vadd.f32 %v2522_v16, %v1003_v54 }
 0x236   : > { %1824 = vpow2.f32 %v971_v38  ;;  %v951_v62 = vmul.f32 1.442695, %v863_v19  ;;  %v953_v11 = vmul.f32 1.442695, %v864_v41  ;;  %977 = vadd.xlane.f32.xlu0 %v976_v0  ;;  %v2534_v9 = vpop.eup %1808  ;;  %v995_v18 = vsel %vm721_vm1, %v2527_v53, 0.0 }
 0x237   : > { %v963_v35 = vmul.f32 1.442695, %v869_v46  ;;  %1826 = vpow2.f32 %v973_v4  ;;  %v965_v43 = vmul.f32 1.442695, %v870_v13  ;;  %v2540_v5 = vpop.eup %1810  ;;  %v996_v20 = vadd.f32 %v2531_v39, %v995_v18 }
 0x238   : > { %v805_v29 = vpop.xlane.xlu0 %804  ;;  %1828 = vpow2.f32 %v951_v62  ;;  %v987_v56 = vsel %vm721_vm1, %v2534_v9, 0.0 }
 0x239   : > { %v865_v17 = vsub.f32 %v2335_v49, %v805_v29  ;;  %v866_v34 = vsub.f32 %v2343_v21, %v805_v29  ;;  %1830 = vpow2.f32 %v953_v11  ;;  %1005 = vadd.xlane.f32.xlu1 %v1004_v48  ;;  %v988_v54 = vadd.f32 %v2540_v5, %v987_v56 }
 0x23a   : > { %1832 = vpow2.f32 %v963_v35  ;;  %v2543_v55 = vpop.eup %1812 }
 0x23b   : > { %v955_v6 = vmul.f32 1.442695, %v865_v17  ;;  %v957_v7 = vmul.f32 1.442695, %v866_v34  ;;  %1834 = vpow2.f32 %v965_v43  ;;  %v3132_v17 = vld [vmem:[#allocation6_spill] sm:$0xff] }
 0x23c   : > { %v797_v26 = vpop.xlane.xlu0 %796 }
 0x23d   : > { %1836 = vpow2.f32 %v955_v6  ;;  %v861_v49 = vsub.f32 %v2315_v37, %v797_v26  ;;  %v862_v21 = vsub.f32 %v2323_v42, %v797_v26  ;;  %v2549_v38 = vpop.eup %1814  ;;  %997 = vadd.xlane.f32.xlu1 %v996_v20  ;;  %v979_v37 = vsel %vm721_vm1, %v2543_v55, 0.0 }
 0x23e   : > { %1838 = vpow2.f32 %v957_v7  ;;  %v2551_v4 = vpop.eup %1816 }
 0x23f   : > { %v947_v22 = vmul.f32 1.442695, %v861_v49  ;;  %v949_v28 = vmul.f32 1.442695, %v862_v21  ;;  %v2553_v44 = vpop.eup %1818  ;;  %v1067_v42 = vsel %vm721_vm1, %v2551_v4, 0.0 }
 0x240   : > { %v793_v47 = vpop.xlane.xlu0 %792  ;;  %v1068_v46 = vadd.f32 %v2549_v38, %v1067_v42  ;;  %v980_v43 = vadd.f32 %v2553_v44, %v979_v37 }
 0x241   : > { %1840 = vpow2.f32 %v947_v22  ;;  %v859_v19 = vsub.f32 %v2305_v31, %v793_v47  ;;  %v860_v41 = vsub.f32 %v2313_v36, %v793_v47  ;;  %v2563_v13 = vpop.eup %1820  ;;  %989 = vadd.xlane.f32.xlu1 %v988_v54 }
 0x242   : > { %1842 = vpow2.f32 %v949_v28  ;;  %v2565_v0 = vpop.eup %1822  ;;  %1069 = vadd.xlane.f32.xlu0 %v1068_v46 }
 0x243   : > { %v943_v62 = vmul.f32 1.442695, %v859_v19  ;;  %v945_v11 = vmul.f32 1.442695, %v860_v41  ;;  %v2567_v35 = vpop.eup %1824  ;;  %v1059_v31 = vsel %vm721_vm1, %v2565_v0, 0.0 }
 0x244   : > { %v789_v48 = vpop.xlane.xlu0 %788  ;;  %v2572_v36 = vpop.eup %1826  ;;  %v1060_v18 = vadd.f32 %v2563_v13, %v1059_v31  ;;  %v1071_v7 = vsel %vm818_vm2, %v2567_v35, 0.0 }
 0x245   : > { %1844 = vpow2.f32 %v943_v62  ;;  %v857_v29 = vsub.f32 %v2295_v25, %v789_v48  ;;  %v858_v34 = vsub.f32 %v3132_v17, %v789_v48  ;;  %v2577_v6 = vpop.eup %1828  ;;  %981 = vadd.xlane.f32.xlu1 %v980_v43  ;;  %v1072_v20 = vsel %vm820_vm3, %v2572_v36, 0.0 }
 0x246   : > { %1846 = vpow2.f32 %v945_v11  ;;  %v2583_v26 = vpop.eup %1830  ;;  %1061 = vadd.xlane.f32.xlu0 %v1060_v18  ;;  %v1073_v25 = vadd.f32 %v1072_v20, %v1071_v7 }
 0x247   : > { %v939_v49 = vmul.f32 1.442695, %v857_v29  ;;  %v941_v21 = vmul.f32 1.442695, %v858_v34  ;;  %v2585_v56 = vpop.eup %1832  ;;  %v1051_v22 = vsel %vm721_vm1, %v2583_v26, 0.0 }
 0x248   : > { %v2589_v28 = vpop.eup %1834  ;;  %v1052_v54 = vadd.f32 %v2577_v6, %v1051_v22 }
 0x249   : > { %1848 = vpow2.f32 %v939_v49  ;;  %1074 = vadd.xlane.f32.xlu1 %v1073_v25  ;;  %v1063_v37 = vsel %vm721_vm1, %v2589_v28, 0.0 }
 0x24a   : > { %v2592_v47 = vpop.eup %1836  ;;  %1850 = vpow2.f32 %v941_v21  ;;  %1053 = vadd.xlane.f32.xlu0 %v1052_v54  ;;  %v1064_v19 = vadd.f32 %v2585_v56, %v1063_v37  ;;  %v2627_v21 = vld [vmem:[%s298_s21] sm:$0xff] }
 0x24b   : > { %v2596_v42 = vpop.eup %1838  ;;  %3136 = vst [vmem:[#allocation9_spill] sm:$0xff] %v2627_v21  ;;  %v1329_v25 = vcombine.high %v2627_v21, %v2627_v21 }
 0x24c   : > { %v1055_v41 = vsel %vm721_vm1, %v2596_v42, 0.0 }
 0x24d   : > { %1065 = vadd.xlane.f32.xlu1 %v1064_v19  ;;  %v1056_v62 = vadd.f32 %v2592_v47, %v1055_v41  ;;  %1701 = vmatprep.mubr.msk.f32.mxu1 %vm721_vm1, %v1329_v25  ;;  %v1202_v25 = vld [vmem:[%s3120_s3 + $0xc0] sm:$0xff] }
 0x24e   : > { %v2601_v46 = vpop.eup %1840 }
 0x24f   : > { %v2604_v11 = vpop.eup %1842 }
 0x250   : > { %v1047_v43 = vsel %vm721_vm1, %v2604_v11, 0.0 }
 0x251   : > { %1057 = vadd.xlane.f32.xlu1 %v1056_v62  ;;  %v1048_v31 = vadd.f32 %v2601_v46, %v1047_v43  ;;  %v2632_v43 = vstv %s1101_s22  ;;  %s1708_s22 = sshll.u32 %s2025_s4, 7  ;;  %s1906_s4 = sshll.u32 %s1965_s15, 4  ;;  %s1907_s4 = int_to_ptr.vmem [resolvable:$false] %s1906_s4 }
 0x252   : > { %v2608_v48 = vpop.eup %1844  ;;  %s1506_s12 = scalar_lea.hbm %s3123_s6, %s1708_s22  ;;  %s1908_s16 = scalar_lea.vmem %s1907_s4, 256 }
 0x253   : > { %3133 = vst [vmem:[#allocation6_spill] sm:$0xff] %v2608_v48  ;;  %v2611_v29 = vpop.eup %1846 }
 0x254   : > { %v1043_v17 = vsel %vm721_vm1, %v2611_v29, 0.0 }
 0x255   : > { %v1044_v34 = vadd.f32 %v2608_v48, %v1043_v17  ;;  %1049 = vadd.xlane.f32.xlu1 %v1048_v31 }
 0x256   : > { %v2616_v18 = vpop.eup %1848 }
 0x257   : > { %3134 = vst [vmem:[#allocation7_spill] sm:$0xff] %v2616_v18  ;;  %v2618_v7 = vpop.eup %1850  ;;  %1045 = vadd.xlane.f32.xlu0 %v1044_v34 }
 0x258   : > { %3135 = vst [vmem:[#allocation8_spill] sm:$0xff] %v2618_v7  ;;  %v1039_v20 = vsel %vm721_vm1, %v2618_v7, 0.0 }
 0x259   : > { %v1040_v49 = vadd.f32 %v2616_v18, %v1039_v20 }
 0x25b   : > { %1041 = vadd.xlane.f32.xlu1 %v1040_v49  ;;  %v1203_v49 = vld [vmem:[%s3120_s3 + $0xc8] sm:$0xff] }
 0x2a7   : > { %v1026_v22 = vpop.xlane.xlu0 %1025 }
 0x2a8   : > { %1852 = vrcp.f32 %v1026_v22 }
 0x2ab   : > { %v1018_v54 = vpop.xlane.xlu0 %1017 }
 0x2ac   : > { %1854 = vrcp.f32 %v1018_v54 }
 0x2ae   : > { %v1038_v37 = vpop.xlane.xlu1 %1037 }
 0x2af   : > { %1856 = vrcp.f32 %v1038_v37  ;;  %v1010_v19 = vpop.xlane.xlu0 %1009 }
 0x2b0   : > { %1858 = vrcp.f32 %v1010_v19 }
 0x2b2   : > { %v1034_v41 = vpop.xlane.xlu1 %1033 }
 0x2b3   : > { %1860 = vrcp.f32 %v1034_v41  ;;  %v1002_v62 = vpop.xlane.xlu0 %1001 }
 0x2b4   : > { %1862 = vrcp.f32 %v1002_v62 }
 0x2b5   : > { %v1853_v31 = vpop.eup %1852 }
 0x2b6   : > { %v1030_v17 = vpop.xlane.xlu1 %1029  ;;  %v1115_v34 = vmul.f32 %v1853_v31, %v2632_v43 }
 0x2b7   : > { %1864 = vrcp.f32 %v1030_v17  ;;  %v994_v20 = vpop.xlane.xlu0 %993 }
 0x2b8   : > { %1866 = vrcp.f32 %v994_v20  ;;  %v1153_v22 = vmul.f32 %v2418_v10, %v1115_v34  ;;  %v1152_v54 = vmul.f32 %v2415_v63, %v1115_v34  ;;  %v1199_v63 = vld [vmem:[%s3120_s3 + $0xa8] sm:$0xff] }
 0x2b9   : > { %v1855_v37 = vpop.eup %1854 }
 0x2ba   : > { %v1022_v19 = vpop.xlane.xlu1 %1021  ;;  %v2649_v41 = vadd.f32 %v1203_v49, %v1153_v22  ;;  %v2651_v62 = vadd.f32 %v1202_v25, %v1152_v54  ;;  %v1113_v31 = vmul.f32 %v1855_v37, %v2632_v43  ;;  %v1198_v25 = vld [vmem:[%s3120_s3 + $0xa0] sm:$0xff]  ;;  %v1209_v37 = vld [vmem:[%s3120_s3 + $0xf8] sm:$0xff] }
 0x2bb   : > { %1868 = vrcp.f32 %v1022_v19  ;;  %v986_v10 = vpop.xlane.xlu0 %985  ;;  %v1208_v19 = vld [vmem:[%s3120_s3 + $0xf0] sm:$0xff] }
 0x2bc   : > { %v1857_v17 = vpop.eup %1856  ;;  %1870 = vrcp.f32 %v986_v10  ;;  %1303 = vst.msk [vmem:[%s2647_s14 + $0xc8] sm:$0xff] %vm721_vm1, %v2649_v41  ;;  %1302 = vst [vmem:[%s2647_s14 + $0xc0] sm:$0xff] %v2651_v62  ;;  %v1149_v20 = vmul.f32 %v2433_v23, %v1113_v31  ;;  %v1148_v49 = vmul.f32 %v2429_v8, %v1113_v31 }
 0x2bd   : > { %v1118_v34 = vmul.f32 %v1857_v17, %v2632_v43  ;;  %v1859_v22 = vpop.eup %1858 }
 0x2be   : > { %v1014_v54 = vpop.xlane.xlu1 %1013  ;;  %v2676_v31 = vadd.f32 %v1199_v63, %v1149_v20  ;;  %v2678_v21 = vadd.f32 %v1198_v25, %v1148_v49  ;;  %v1111_v18 = vmul.f32 %v1859_v22, %v2632_v43  ;;  %v1207_v20 = vld [vmem:[%s3120_s3 + $0xe8] sm:$0xff]  ;;  %v1206_v49 = vld [vmem:[%s3120_s3 + $0xe0] sm:$0xff] }
 0x2bf   : > { %1872 = vrcp.f32 %v1014_v54  ;;  %v1159_v23 = vmul.f32 %v2440_v3, %v1118_v34  ;;  %v1158_v8 = vmul.f32 %v2435_v32, %v1118_v34  ;;  %v978_v10 = vpop.xlane.xlu0 %977  ;;  %v1195_v32 = vld [vmem:[%s3120_s3 + $0x88] sm:$0xff]  ;;  %v1194_v3 = vld [vmem:[%s3120_s3 + $0x80] sm:$0xff] }
 0x2c0   : > { %v1861_v17 = vpop.eup %1860  ;;  %1874 = vrcp.f32 %v978_v10  ;;  %1299 = vst.msk [vmem:[%s2647_s14 + $0xa8] sm:$0xff] %vm721_vm1, %v2676_v31  ;;  %1298 = vst [vmem:[%s2647_s14 + $0xa0] sm:$0xff] %v2678_v21  ;;  %v1145_v25 = vmul.f32 %v2450_v45, %v1111_v18  ;;  %v1144_v22 = vmul.f32 %v2444_v40, %v1111_v18  ;;  %v1191_v45 = vld [vmem:[%s3120_s3 + $0x68] sm:$0xff] }
 0x2c1   : > { %v1259_v7 = vadd.f32 %v1209_v37, %v1159_v23  ;;  %v1258_v48 = vadd.f32 %v1208_v19, %v1158_v8  ;;  %v1117_v54 = vmul.f32 %v1861_v17, %v2632_v43  ;;  %v1863_v63 = vpop.eup %1862 }
 0x2c2   : > { %v1006_v34 = vpop.xlane.xlu1 %1005  ;;  %v1109_v23 = vmul.f32 %v1863_v63, %v2632_v43  ;;  %v2708_v17 = vadd.f32 %v1195_v32, %v1145_v25  ;;  %v2710_v40 = vadd.f32 %v1194_v3, %v1144_v22  ;;  %v1205_v32 = vld [vmem:[%s3120_s3 + $0xd8] sm:$0xff]  ;;  %v1204_v3 = vld [vmem:[%s3120_s3 + $0xd0] sm:$0xff] }
 0x2c3   : > { %1876 = vrcp.f32 %v1006_v34  ;;  %1309 = vst.msk [vmem:[%s2647_s14 + $0xf8] sm:$0xff] %vm721_vm1, %v1259_v7  ;;  %1676 = vmatprep.subr.msk.mxu1 %vm721_vm1, %v1259_v7  ;;  %1308 = vst [vmem:[%s2647_s14 + $0xf0] sm:$0xff] %v1258_v48  ;;  %v1157_v37 = vmul.f32 %v2458_v50, %v1117_v54  ;;  %v1156_v19 = vmul.f32 %v2453_v51, %v1117_v54 }
 0x2c4   : > { %v1865_v8 = vpop.eup %1864  ;;  %1408 = vmatpush1.xpose.msra.mxu1 %v1258_v48  ;;  %v1141_v7 = vmul.f32 %v2466_v59, %v1109_v23  ;;  %v1190_v48 = vld [vmem:[%s3120_s3 + $0x60] sm:$0xff]  ;;  %1295 = vst.msk [vmem:[%s2647_s14 + $0x88] sm:$0xff] %vm721_vm1, %v2708_v17  ;;  %1294 = vst [vmem:[%s2647_s14 + $0x80] sm:$0xff] %v2710_v40  ;;  %v1140_v59 = vmul.f32 %v2462_v61, %v1109_v23 }
 0x2c5   : > { %v1257_v18 = vadd.f32 %v1207_v20, %v1157_v37  ;;  %v1256_v50 = vadd.f32 %v1206_v49, %v1156_v19  ;;  %v1116_v51 = vmul.f32 %v1865_v8, %v2632_v43  ;;  %v1867_v10 = vpop.eup %1866 }
 0x2c6   : > { %v998_v54 = vpop.xlane.xlu1 %997  ;;  %v2738_v20 = vadd.f32 %v1191_v45, %v1141_v7  ;;  %v2740_v25 = vadd.f32 %v1190_v48, %v1140_v59  ;;  %v1107_v61 = vmul.f32 %v1867_v10, %v2632_v43  ;;  %v1201_v45 = vld [vmem:[%s3120_s3 + $0xb8] sm:$0xff] }
 0x2c7   : > { %1878 = vrcp.f32 %v998_v54  ;;  %1307 = vst.msk [vmem:[%s2647_s14 + $0xe8] sm:$0xff] %vm721_vm1, %v1257_v18  ;;  %1677 = vmatprep.subr.msk.mxu1 %vm721_vm1, %v1257_v18  ;;  %1306 = vst [vmem:[%s2647_s14 + $0xe0] sm:$0xff] %v1256_v50  ;;  %v1155_v63 = vmul.f32 %v2425_v24, %v1116_v51  ;;  %v1154_v34 = vmul.f32 %v2421_v15, %v1116_v51  ;;  %v1187_v15 = vld [vmem:[%s3120_s3 + $0x48] sm:$0xff]  ;;  %v1186_v24 = vld [vmem:[%s3120_s3 + $0x40] sm:$0xff] }
 0x2c8   : > { %v1869_v49 = vpop.eup %1868  ;;  %1410 = vmatpush1.xpose.msra.mxu1 %v1256_v50  ;;  %1291 = vst.msk [vmem:[%s2647_s14 + $0x68] sm:$0xff] %vm721_vm1, %v2738_v20  ;;  %v1200_v18 = vld [vmem:[%s3120_s3 + $0xb0] sm:$0xff]  ;;  %1290 = vst [vmem:[%s2647_s14 + $0x60] sm:$0xff] %v2740_v25  ;;  %v1137_v50 = vmul.f32 %v2480_v33, %v1107_v61  ;;  %v1136_v51 = vmul.f32 %v2478_v57, %v1107_v61 }
 0x2c9   : > { %v1255_v22 = vadd.f32 %v1205_v32, %v1155_v63  ;;  %v1254_v37 = vadd.f32 %v1204_v3, %v1154_v34  ;;  %v1114_v19 = vmul.f32 %v1869_v49, %v2632_v43  ;;  %v1871_v23 = vpop.eup %1870  ;;  %v1183_v3 = vld [vmem:[%s3120_s3 + $0x28] sm:$0xff]  ;;  %v1182_v34 = vld [vmem:[%s3120_s3 + $0x20] sm:$0xff] }
 0x2ca   : > { %v990_v8 = vpop.xlane.xlu1 %989  ;;  %v1105_v54 = vmul.f32 %v1871_v23, %v2632_v43  ;;  %v2770_v33 = vadd.f32 %v1187_v15, %v1137_v50  ;;  %v2772_v57 = vadd.f32 %v1186_v24, %v1136_v51  ;;  %v1193_v51 = vld [vmem:[%s3120_s3 + $0x78] sm:$0xff] }
 0x2cb   : > { %1880 = vrcp.f32 %v990_v8  ;;  %1305 = vst.msk [vmem:[%s2647_s14 + $0xd8] sm:$0xff] %vm721_vm1, %v1255_v22  ;;  %1678 = vmatprep.subr.msk.mxu1 %vm721_vm1, %v1255_v22  ;;  %1304 = vst [vmem:[%s2647_s14 + $0xd0] sm:$0xff] %v1254_v37  ;;  %v1070_v7 = vpop.xlane.xlu0 %1069  ;;  %v1151_v48 = vmul.f32 %v2472_v30, %v1114_v19  ;;  %v1150_v10 = vmul.f32 %v2483_v2, %v1114_v19  ;;  %v1197_v22 = vld [vmem:[%s3120_s3 + $0x98] sm:$0xff] }
 0x2cc   : > { %v1873_v32 = vpop.eup %1872  ;;  %1412 = vmatpush1.xpose.msra.mxu1 %v1254_v37  ;;  %1882 = vrcp.f32 %v1070_v7  ;;  %v1133_v63 = vmul.f32 %v2497_v52, %v1105_v54  ;;  %1287 = vst.msk [vmem:[%s2647_s14 + $0x48] sm:$0xff] %vm721_vm1, %v2770_v33  ;;  %1286 = vst [vmem:[%s2647_s14 + $0x40] sm:$0xff] %v2772_v57  ;;  %v1132_v52 = vmul.f32 %v2495_v14, %v1105_v54  ;;  %v1192_v7 = vld [vmem:[%s3120_s3 + $0x70] sm:$0xff] }
 0x2cd   : > { %1679 = vmatprep.subr.msk.mxu1 %vm721_vm1, %v2649_v41  ;;  %v1251_v30 = vadd.f32 %v1201_v45, %v1151_v48  ;;  %v1250_v2 = vadd.f32 %v1200_v18, %v1150_v10  ;;  %v1112_v59 = vmul.f32 %v1873_v32, %v2632_v43  ;;  %v1875_v49 = vpop.eup %1874  ;;  %v1196_v41 = vld [vmem:[%s3120_s3 + $0x90] sm:$0xff] }
 0x2ce   : > { %v982_v61 = vpop.xlane.xlu1 %981  ;;  %v2801_v24 = vadd.f32 %v1183_v3, %v1133_v63  ;;  %v2804_v8 = vadd.f32 %v1182_v34, %v1132_v52  ;;  %v1103_v14 = vmul.f32 %v1875_v49, %v2632_v43 }
 0x2cf   : > { %1884 = vrcp.f32 %v982_v61  ;;  %1301 = vst.msk [vmem:[%s2647_s14 + $0xb8] sm:$0xff] %vm721_vm1, %v1251_v30  ;;  %v1062_v37 = vpop.xlane.xlu0 %1061  ;;  %1300 = vst [vmem:[%s2647_s14 + $0xb0] sm:$0xff] %v1250_v2  ;;  %v1147_v19 = vmul.f32 %v2488_v1, %v1112_v59  ;;  %v1146_v15 = vmul.f32 %v2499_v12, %v1112_v59  ;;  %v1179_v12 = vld [vmem:[%s3120_s3 + $0x8] sm:$0xff] }
 0x2d0   : > { %v1877_v23 = vpop.eup %1876  ;;  %1414 = vmatpush1.xpose.msra.mxu1 %v2651_v62  ;;  %1886 = vrcp.f32 %v1062_v37  ;;  %1283 = vst.msk [vmem:[%s2647_s14 + $0x28] sm:$0xff] %vm721_vm1, %v2801_v24  ;;  %v1178_v62 = vld [vmem:[%s3120_s3] sm:$0xff]  ;;  %1282 = vst [vmem:[%s2647_s14 + $0x20] sm:$0xff] %v2804_v8  ;;  %v1129_v48 = vmul.f32 %v2515_v27, %v1103_v14  ;;  %v1128_v10 = vmul.f32 %v2511_v58, %v1103_v14  ;;  %v1225_v14 = vld [vmem:[%s3120_s3 + $0x178] sm:$0xff] }
 0x2d1   : > { %1680 = vmatprep.subr.msk.mxu1 %vm721_vm1, %v1251_v30  ;;  %v1247_v45 = vadd.f32 %v1197_v22, %v1147_v19  ;;  %v1246_v18 = vadd.f32 %v1196_v41, %v1146_v15  ;;  %v1110_v1 = vmul.f32 %v1877_v23, %v2632_v43  ;;  %v1185_v15 = vld [vmem:[%s3120_s3 + $0x38] sm:$0xff] }
 0x2d2   : > { %v1075_v50 = vpop.xlane.xlu1 %1074  ;;  %v2833_v59 = vadd.f32 %v1179_v12, %v1129_v48  ;;  %v2835_v27 = vadd.f32 %v1178_v62, %v1128_v10 }
 0x2d3   : > { %1888 = vrcp.f32 %v1075_v50  ;;  %v1054_v54 = vpop.xlane.xlu0 %1053  ;;  %1297 = vst.msk [vmem:[%s2647_s14 + $0x98] sm:$0xff] %vm721_vm1, %v1247_v45  ;;  %1296 = vst [vmem:[%s2647_s14 + $0x90] sm:$0xff] %v1246_v18  ;;  %v1143_v32 = vmul.f32 %v2506_v60, %v1110_v1  ;;  %v1142_v3 = vmul.f32 %v2522_v16, %v1110_v1  ;;  %v1189_v16 = vld [vmem:[%s3120_s3 + $0x58] sm:$0xff] }
 0x2d4   : > { %v1879_v30 = vpop.eup %1878  ;;  %1416 = vmatpush1.xpose.msra.mxu1 %v1250_v2  ;;  %1890 = vrcp.f32 %v1054_v54  ;;  %v1188_v2 = vld [vmem:[%s3120_s3 + $0x50] sm:$0xff]  ;;  %1279 = vst.msk [vmem:[%s2647_s14 + $0x8] sm:$0xff] %vm721_vm1, %v2833_v59  ;;  %1278 = vst [vmem:[%s2647_s14] sm:$0xff] %v2835_v27 }
 0x2d5   : > { %1681 = vmatprep.subr.msk.mxu1 %vm721_vm1, %v2676_v31  ;;  %v1243_v58 = vadd.f32 %v1193_v51, %v1143_v32  ;;  %v2839_v63 = vadd.f32 %v1192_v7, %v1142_v3  ;;  %v1108_v34 = vmul.f32 %v1879_v30, %v2632_v43  ;;  %v1221_v3 = vld [vmem:[%s3120_s3 + $0x158] sm:$0xff]  ;;  %v1220_v30 = vld [vmem:[%s3120_s3 + $0x150] sm:$0xff] }
 0x2d6   : > { %v1066_v60 = vpop.xlane.xlu1 %1065 }
 0x2d7   : > { %1892 = vrcp.f32 %v1066_v60  ;;  %1293 = vst.msk [vmem:[%s2647_s14 + $0x78] sm:$0xff] %vm721_vm1, %v1243_v58  ;;  %1292 = vst [vmem:[%s2647_s14 + $0x70] sm:$0xff] %v2839_v63  ;;  %v1139_v31 = vmul.f32 %v2527_v53, %v1108_v34  ;;  %v1138_v49 = vmul.f32 %v2531_v39, %v1108_v34  ;;  %v1184_v53 = vld [vmem:[%s3120_s3 + $0x30] sm:$0xff] }
 0x2d8   : > { %v1881_v61 = vpop.eup %1880  ;;  %1418 = vmatpush1.xpose.msra.mxu1 %v2678_v21 }
 0x2d9   : > { %v1883_v22 = vpop.eup %1882  ;;  %1682 = vmatprep.subr.msk.mxu1 %vm721_vm1, %v1247_v45  ;;  %v2861_v41 = vadd.f32 %v1189_v16, %v1139_v31  ;;  %v2863_v52 = vadd.f32 %v1188_v2, %v1138_v49  ;;  %v1106_v37 = vmul.f32 %v1881_v61, %v2632_v43  ;;  %v1224_v45 = vld [vmem:[%s3120_s3 + $0x170] sm:$0xff]  ;;  %v1227_v31 = vld [vmem:[%s3120_s3 + $0x188] sm:$0xf] }
 0x2da   : > { %v1058_v19 = vpop.xlane.xlu1 %1057  ;;  %v1126_v39 = vmul.f32 %v1883_v22, %v2632_v43 }
 0x2db   : > { %1894 = vrcp.f32 %v1058_v19  ;;  %1289 = vst.msk [vmem:[%s2647_s14 + $0x58] sm:$0xff] %vm721_vm1, %v2861_v41  ;;  %1288 = vst [vmem:[%s2647_s14 + $0x50] sm:$0xff] %v2863_v52  ;;  %v1135_v21 = vmul.f32 %v2534_v9, %v1106_v37  ;;  %v1134_v23 = vmul.f32 %v2540_v5, %v1106_v37  ;;  %v1217_v19 = vld [vmem:[%s3120_s3 + $0x138] sm:$0xff] }
 0x2dc   : > { %v1885_v1 = vpop.eup %1884  ;;  %1420 = vmatpush1.xpose.msra.mxu1 %v1246_v18  ;;  %v1175_v12 = vmul.f32 %v2551_v4, %v1126_v39  ;;  %v1174_v62 = vmul.f32 %v2549_v38, %v1126_v39  ;;  %v1181_v18 = vld [vmem:[%s3120_s3 + $0x18] sm:$0xff]  ;;  %v1180_v38 = vld [vmem:[%s3120_s3 + $0x10] sm:$0xff] }
 0x2dd   : > { %v1887_v50 = vpop.eup %1886  ;;  %1683 = vmatprep.subr.msk.mxu1 %vm721_vm1, %v2708_v17  ;;  %v2890_v9 = vadd.f32 %v1185_v15, %v1135_v21  ;;  %v2892_v5 = vadd.f32 %v1184_v53, %v1134_v23  ;;  %v1104_v51 = vmul.f32 %v1885_v1, %v2632_v43  ;;  %v1216_v15 = vld [vmem:[%s3120_s3 + $0x130] sm:$0xff]  ;;  %v1223_v23 = vld [vmem:[%s3120_s3 + $0x168] sm:$0xff] }
 0x2de   : > { %v1050_v7 = vpop.xlane.xlu1 %1049  ;;  %v2901_v4 = vadd.f32 %v1225_v14, %v1175_v12  ;;  %v2903_v17 = vadd.f32 %v1224_v45, %v1174_v62  ;;  %v1124_v48 = vmul.f32 %v1887_v50, %v2632_v43 }
 0x2df   : > { %1896 = vrcp.f32 %v1050_v7  ;;  %1285 = vst.msk [vmem:[%s2647_s14 + $0x38] sm:$0xff] %vm721_vm1, %v2890_v9  ;;  %1284 = vst [vmem:[%s2647_s14 + $0x30] sm:$0xff] %v2892_v5  ;;  %v1131_v54 = vmul.f32 %v2543_v55, %v1104_v51  ;;  %v1130_v32 = vmul.f32 %v2553_v44, %v1104_v51 }
 0x2e0   : > { %v1046_v10 = vpop.xlane.xlu0 %1045  ;;  %v1889_v34 = vpop.eup %1888  ;;  %1422 = vmatpush1.xpose.msra.mxu1 %v2710_v40  ;;  %1325 = vst.msk [vmem:[%s2647_s14 + $0x178] sm:$0xff] %vm721_vm1, %v2901_v4  ;;  %1324 = vst [vmem:[%s2647_s14 + $0x170] sm:$0xff] %v2903_v17  ;;  %v1171_v55 = vmul.f32 %v2565_v0, %v1124_v48  ;;  %v1170_v44 = vmul.f32 %v2563_v13, %v1124_v48  ;;  %v1226_v0 = vld [vmem:[%s3120_s3 + $0x180] sm:$0xf] }
 0x2e1   : > { %1898 = vrcp.f32 %v1046_v10  ;;  %v1891_v60 = vpop.eup %1890  ;;  %1684 = vmatprep.subr.msk.mxu1 %vm721_vm1, %v1243_v58  ;;  %v2928_v16 = vadd.f32 %v1181_v18, %v1131_v54  ;;  %v2930_v2 = vadd.f32 %v1180_v38, %v1130_v32  ;;  %v1127_v40 = vmul.f32 %v1889_v34, %v2632_v43  ;;  %v1215_v10 = vld [vmem:[%s3120_s3 + $0x128] sm:$0xff]  ;;  %v1213_v54 = vld [vmem:[%s3120_s3 + $0x118] sm:$0xff]  ;;  %v1212_v32 = vld [vmem:[%s3120_s3 + $0x110] sm:$0xff] }
 0x2e2   : > { %v2939_v13 = vadd.f32 %v1221_v3, %v1171_v55  ;;  %v2941_v49 = vadd.f32 %v1220_v30, %v1170_v44  ;;  %v1122_v58 = vmul.f32 %v1891_v60, %v2632_v43  ;;  %v3137_v30 = vld [vmem:[#allocation6_spill] sm:$0xff] }
 0x2e3   : > { %1281 = vst.msk [vmem:[%s2647_s14 + $0x18] sm:$0xff] %vm721_vm1, %v2928_v16  ;;  %1280 = vst [vmem:[%s2647_s14 + $0x10] sm:$0xff] %v2930_v2  ;;  %v1177_v22 = vmul.f32 %v2572_v36, %v1127_v40  ;;  %v1176_v37 = vmul.f32 %v2567_v35, %v1127_v40 }
 0x2e4   : > { %v1042_v61 = vpop.xlane.xlu1 %1041  ;;  %v1893_v53 = vpop.eup %1892  ;;  %1424 = vmatpush1.xpose.msra.mxu1 %v2839_v63  ;;  %1321 = vst.msk [vmem:[%s2647_s14 + $0x158] sm:$0xff] %vm721_vm1, %v2939_v13  ;;  %1320 = vst [vmem:[%s2647_s14 + $0x150] sm:$0xff] %v2941_v49  ;;  %v1167_v35 = vmul.f32 %v2583_v26, %v1122_v58  ;;  %v1166_v36 = vmul.f32 %v2577_v6, %v1122_v58  ;;  %v1222_v26 = vld [vmem:[%s3120_s3 + $0x160] sm:$0xff] }
 0x2e5   : > { %1900 = vrcp.f32 %v1042_v61  ;;  %1685 = vmatprep.subr.msk.mxu1 %vm721_vm1, %v2738_v20  ;;  %v2967_v39 = vadd.f32 %v1227_v31, %v1177_v22  ;;  %v2969_v21 = vadd.f32 %v1226_v0, %v1176_v37  ;;  %v1125_v63 = vmul.f32 %v1893_v53, %v2632_v43  ;;  %v3139_v0 = vld [vmem:[#allocation7_spill] sm:$0xff] }
 0x2e6   : > { %v2978_v14 = vadd.f32 %v1217_v19, %v1167_v35  ;;  %v2980_v6 = vadd.f32 %v1216_v15, %v1166_v36 }
 0x2e7   : > { %1327 = vst.msk [vmem:[%s2647_s14 + $0x188] sm:$0xf] %vm820_vm3, %v2967_v39  ;;  %1326 = vst [vmem:[%s2647_s14 + $0x180] sm:$0xf] %v2969_v21  ;;  %v1173_v20 = vmul.f32 %v2589_v28, %v1125_v63  ;;  %v1172_v45 = vmul.f32 %v2585_v56, %v1125_v63  ;;  %v1219_v28 = vld [vmem:[%s3120_s3 + $0x148] sm:$0xff]  ;;  %v1218_v56 = vld [vmem:[%s3120_s3 + $0x140] sm:$0xff] }
 0x2e8   : > { %v1895_v1 = vpop.eup %1894  ;;  %1426 = vmatpush1.xpose.msra.mxu1 %v2740_v25  ;;  %1317 = vst.msk [vmem:[%s2647_s14 + $0x138] sm:$0xff] %vm721_vm1, %v2978_v14  ;;  %1316 = vst [vmem:[%s2647_s14 + $0x130] sm:$0xff] %v2980_v6 }
 0x2e9   : > { %1686 = vmatprep.subr.msk.mxu1 %vm721_vm1, %v2861_v41  ;;  %v1273_v12 = vadd.f32 %v1223_v23, %v1173_v20  ;;  %v1272_v62 = vadd.f32 %v1222_v26, %v1172_v45  ;;  %v1123_v50 = vmul.f32 %v1895_v1, %v2632_v43 }
 0x2eb   : > { %1323 = vst.msk [vmem:[%s2647_s14 + $0x168] sm:$0xff] %vm721_vm1, %v1273_v12  ;;  %1322 = vst [vmem:[%s2647_s14 + $0x160] sm:$0xff] %v1272_v62  ;;  %v1169_v25 = vmul.f32 %v2596_v42, %v1123_v50  ;;  %v1168_v41 = vmul.f32 %v2592_v47, %v1123_v50  ;;  %v1214_v42 = vld [vmem:[%s3120_s3 + $0x120] sm:$0xff] }
 0x2ec   : > { %v1897_v51 = vpop.eup %1896  ;;  %1428 = vmatpush1.xpose.msra.mxu1 %v2863_v52 }
 0x2ed   : > { %1687 = vmatprep.subr.msk.mxu1 %vm721_vm1, %v2770_v33  ;;  %v1269_v18 = vadd.f32 %v1219_v28, %v1169_v25  ;;  %v1268_v38 = vadd.f32 %v1218_v56, %v1168_v41  ;;  %v1121_v48 = vmul.f32 %v1897_v51, %v2632_v43 }
 0x2ee   : > { %v1899_v7 = vpop.eup %1898 }
 0x2ef   : > { %v1120_v47 = vmul.f32 %v1899_v7, %v2632_v43  ;;  %1319 = vst.msk [vmem:[%s2647_s14 + $0x148] sm:$0xff] %vm721_vm1, %v1269_v18  ;;  %1318 = vst [vmem:[%s2647_s14 + $0x140] sm:$0xff] %v1268_v38  ;;  %v1165_v33 = vmul.f32 %v2604_v11, %v1121_v48  ;;  %v1164_v52 = vmul.f32 %v2601_v46, %v1121_v48 }
 0x2f0   : > { %1430 = vmatpush1.xpose.msra.mxu1 %v2772_v57  ;;  %v1210_v57 = vld [vmem:[%s3120_s3 + $0x100] sm:$0xff] }
 0x2f1   : > { %v1163_v3 = vmul.f32 %v2611_v29, %v1120_v47  ;;  %v1162_v34 = vmul.f32 %v3137_v30, %v1120_v47  ;;  %1688 = vmatprep.subr.msk.mxu1 %vm721_vm1, %v2890_v9  ;;  %v1265_v46 = vadd.f32 %v1215_v10, %v1165_v33  ;;  %v1264_v11 = vadd.f32 %v1214_v42, %v1164_v52  ;;  %v1211_v29 = vld [vmem:[%s3120_s3 + $0x108] sm:$0xff]  ;;  %v3138_v9 = vld [vmem:[#allocation8_spill] sm:$0xff] }
 0x2f2   : > { %v1901_v55 = vpop.eup %1900 }
 0x2f3   : > { %v1263_v44 = vadd.f32 %v1213_v54, %v1163_v3  ;;  %v1262_v60 = vadd.f32 %v1212_v32, %v1162_v34  ;;  %v1119_v40 = vmul.f32 %v1901_v55, %v2632_v43  ;;  %1315 = vst.msk [vmem:[%s2647_s14 + $0x128] sm:$0xff] %vm721_vm1, %v1265_v46  ;;  %1314 = vst [vmem:[%s2647_s14 + $0x120] sm:$0xff] %v1264_v11 }
 0x2f4   : > { %1432 = vmatpush1.xpose.msra.mxu1 %v2892_v5 }
 0x2f5   : > { %1313 = vst.msk [vmem:[%s2647_s14 + $0x118] sm:$0xff] %vm721_vm1, %v1263_v44  ;;  %1312 = vst [vmem:[%s2647_s14 + $0x110] sm:$0xff] %v1262_v60  ;;  %v1161_v31 = vmul.f32 %v3138_v9, %v1119_v40  ;;  %v1160_v43 = vmul.f32 %v3139_v0, %v1119_v40  ;;  %1689 = vmatprep.subr.msk.mxu1 %vm721_vm1, %v2801_v24  ;;  %v3140_v24 = vld [vmem:[#allocation9_spill] sm:$0xff] }
 0x2f7   : > { %v1261_v58 = vadd.f32 %v1211_v29, %v1161_v31  ;;  %v1260_v61 = vadd.f32 %v1210_v57, %v1160_v43 }
 0x2f8   : > { %1434 = vmatpush1.xpose.msra.mxu1 %v2804_v8 }
 0x2f9   : > { %1311 = vst.msk [vmem:[%s2647_s14 + $0x108] sm:$0xff] %vm721_vm1, %v1261_v58  ;;  %1310 = vst [vmem:[%s2647_s14 + $0x100] sm:$0xff] %v1260_v61  ;;  %1690 = vmatprep.subr.msk.mxu1 %vm721_vm1, %v2928_v16  ;;  %s281_s14 = sand.u32 1, %s1954_s24  }
 0x2fa   : > { %s1620_s21 = sshll.u32 %s281_s14, 3  ;;  %s1491_s10 = scalar_lea.sflag [#allocation4], %s281_s14 }
 0x2fb   : > { %s283_s27 = scalar_lea.vmem [#allocation3], %s1620_s21 }
 0x2fc   : > { %1436 = vmatpush1.xpose.msra.mxu1 %v2930_v2  ;;  %s1508_s29 = sshll.u32 %s283_s27, 4  ;;  %s1509_s29 = int_to_ptr.vmem [resolvable:$true] %s1508_s29 }
 0x2fd   : > { %1691 = vmatprep.subr.msk.mxu1 %vm721_vm1, %v2833_v59  ;;  %s1902_s13 = scalar_lea.vmem %s1509_s29, 128  ;;  %p1909_p0 = scmp.lt.s32.totalorder %s1509_s29, %s1907_s4 }
 0x2fe   : > { %p1903_p11 = scmp.ne.s32.totalorder %s1509_s29, %s1902_s13  ;;  %p1910_p1 = scmp.lt.s32.totalorder %s1908_s16, %s1902_s13 }
 0x300   : > { %1438 = vmatpush1.xpose.msra.mxu1 %v2835_v27  ;;  %p1904_p12 = pnand %p1903_p11, %p2042_p5  ;;  %p1911_p2 = por %p1910_p1, %p1909_p0 }
 0x301   : > { %1692 = vmatprep.subr.msk.mxu1 %vm721_vm1, %v2967_v39 }
 0x302   : > { %p1905_p13 = pneg %p1904_p12 }
 0x304   : > { %1454 = vmatpush2.xpose.msra.mxu1 %v2969_v21  ;;  %p1912_p3 = pnand %p1911_p2, %p1905_p13 }
 0x305   : > { %1693 = vmatprep.subr.msk.mxu1 %vm721_vm1, %v2901_v4 }
 0x308   : > { %1456 = vmatpush2.xpose.msra.mxu1 %v2903_v17 }
 0x309   : > { %1694 = vmatprep.subr.msk.mxu1 %vm721_vm1, %v1273_v12 }
 0x30c   : > { %1458 = vmatpush2.xpose.msra.mxu1 %v1272_v62 }
 0x30d   : > { %1695 = vmatprep.subr.msk.mxu1 %vm721_vm1, %v2939_v13 }
 0x310   : > { %1460 = vmatpush2.xpose.msra.mxu1 %v2941_v49 }
 0x311   : > { %1696 = vmatprep.subr.msk.mxu1 %vm721_vm1, %v1269_v18 }
 0x314   : > { %1462 = vmatpush2.xpose.msra.mxu1 %v1268_v38 }
 0x315   : > { %1697 = vmatprep.subr.msk.mxu1 %vm721_vm1, %v2978_v14 }
 0x318   : > { %1464 = vmatpush2.xpose.msra.mxu1 %v2980_v6 }
 0x319   : > { %1698 = vmatprep.subr.msk.mxu1 %vm721_vm1, %v1265_v46 }
 0x31c   : > { %1466 = vmatpush2.xpose.msra.mxu1 %v1264_v11 }
 0x31d   : > { %1699 = vmatprep.subr.msk.mxu1 %vm721_vm1, %v1263_v44 }
 0x320   : > { %1468 = vmatpush2.xpose.msra.mxu1 %v1262_v60 }
 0x321   : > { %1700 = vmatprep.subr.msk.mxu1 %vm721_vm1, %v1261_v58 }
 0x324   : > { %1470 = vmatpush2.xpose.msra.mxu1 %v1260_v61 }
 0x327   : > { %1472 = vmatmul.mubr.f32.vlgmr.msra.gmra.mxu1 %v3140_v24 }
 0x3e7   : > { %v1473_v8 = vpop.f32.mrf.mxu1 }
 0x3e9   : > { %v1475_v59 = vpop.f32.mrf.mxu1 }
 0x3ea   : > { %v1480_v27 = vcombine.low %v1473_v8, %v1475_v59 }
 0x3ec   : > { %1484 = vst.msk [vmem:[%s283_s27] sm:$0xff] %vm1483_vm5, %v1480_v27 }
 0x3ed   : > { %1915 = shalt.err (!%p1912_p3)
}
 0x3ee   : > { %s1916_s17 = scalar_lea.hbm %s1506_s12, 128  ;;  %s1920_s20 = scalar_lea.hbm %s3123_s6, 256 }
 0x3ef   : > { %p1917_p4 = scmp.ne.s32.totalorder %s1506_s12, %s1916_s17  ;;  %p1921_p9 = scmp.lt.s32.totalorder %s1506_s12, %s3123_s6 }
 0x3f0   : > { %p1922_p10 = scmp.lt.s32.totalorder %s1920_s20, %s1916_s17 }
 0x3f1   : > { %p1918_p7 = pnand %p1917_p4, %p2042_p5 }
 0x3f2   : > { %p1923_p11 = por %p1922_p10, %p1921_p9 }
 0x3f3   : > { %p1919_p8 = pneg %p1918_p7 }
 0x3f5   : > { %p1924_p12 = pnand %p1923_p11, %p1919_p8 }
 0x3f7   : > { %1927 = shalt.err (!%p1924_p12)
}
 0x3f8   : > { %1711 = dma.vmem_to_hbm [thread:$0]  (%p2042_p5), %s1509_s29, 128, %s1506_s12, %s1491_s10  }
 0x3f9 PF: > { %p1717_p13 = scmp.ge.s32.totalorder %s1962_s26, 2  ;;  %s1528_s22 = sand.u32 1, %s1950_s23  }
 0x3fa   : > { %s1529_s27 = scalar_lea.sflag [#allocation4], %s1528_s22 }
 0x3fb   : > { %p1714_p0 = pnand %p1717_p13, %p2046_p6 }
 0x3fd   : > { %p1715_p1 = pneg %p1714_p0 }
 0x3ff   : > { %1945 = dma.done.wait (%p1715_p1), %s1529_s27, 128  }
 0x400   : > { %1947 = vsyncadd (%p1715_p1), %s1529_s27, 4294967168  ;;  %p18_p2 = scmp.ge.s32.totalorder %s2029_s28, 4   ;;  %s3141_s23 = smov %s1954_s24 }
 0x401   : > { %s3142_s24 = smov %s1958_s25  ;;  %s3143_s25 = smov %s2040_s7 }
 0x402   : > { %s3144_s26 = smov %s2029_s28  ;;  %20 = sbr.rel (!%p18_p2) target bundleno = 5 (0x5), region = 93 }
 0x407   :  { %1534 = vsyncpa [#allocation4], 1 }
 0x408   :  { %1536 = vsyncpa [#allocation4 + $0x1], 1 }

</bundles_post_ra>
